<compile_context>
chip_gen: v7x
topology: tpu7x:2x2x1
jax: 0.10.0
libtpu: 0.0.40
codegen_flags: <defaults>
</compile_context>

<pallas_src>
import functools

import numpy as np
import jax
import jax.numpy as jnp
from jax.experimental import pallas as pl
from jax.experimental.pallas import tpu as pltpu


# ----------------------------------------------------------------------------
# Deterministic parameter construction (same formula as the PyTorch module)
# ----------------------------------------------------------------------------
def get_impulse_response(alpha: float, sps: int, filter_span: int) -> np.ndarray:
    if alpha <= 0.0 or alpha >= 1.0:
        raise ValueError(f"Alpha must be between (0, 1.0), not {alpha}")
    if sps < 2:
        raise ValueError(f"Sps must be 2 or more, not {sps}")
    if filter_span <= 0:
        raise ValueError(f"Filter span must be a positive integer, not {filter_span}")
    filter_len = 2 * filter_span * sps + 1
    h = np.zeros(filter_len)
    for t in np.arange(-filter_span * sps, filter_span * sps + 1):
        i = t + filter_span * sps
        if t == 0:
            h[i] = 1 + alpha * (4 / np.pi - 1)
            h[i] *= 1.0 / np.sqrt(sps)
        else:
            h[i] = np.sin((1 - alpha) * np.pi * t / sps)
            h[i] /= 4 * alpha * t / sps
            h[i] += np.cos((1 + alpha) * np.pi * t / sps)
            h[i] *= 2.0 * alpha / (np.pi * np.sqrt(sps))
            h[i] /= 1.0 - (4.0 * alpha * t / sps) ** 2
            h[i] *= 2.0
    return h.astype(np.float32)


# ----------------------------------------------------------------------------
# Banded Toeplitz weights.
# Conceptual input per output tile: [left halo | main tile | right halo] covering
# signal columns [j*tile_w - halo_w, (j+1)*tile_w + halo_w).
#   y[j*tile_w + q] = sum_t h[t] * x_zero_ext[j*tile_w + q + t - left]
# so full[p, q] = h[t] with p = q + t - left + halo_w.
# Split into the main band (tile_w x tile_w) and the stacked halo band
# (2*halo_w x tile_w) that multiplies concat([left_halo, right_halo]).
# ----------------------------------------------------------------------------
def make_banded_weights(h_np: np.ndarray, tile_w: int, halo_w: int, left: int):
    n_taps = h_np.shape[0]
    assert left <= halo_w and (n_taps - 1 - left) <= halo_w, "halo must cover filter"
    full = np.zeros((halo_w + tile_w + halo_w, tile_w), np.float32)
    q = np.arange(tile_w)
    for t in range(n_taps):
        full[q + t - left + halo_w, q] = h_np[t]
    w_main = np.ascontiguousarray(full[halo_w:halo_w + tile_w])
    w_halo = np.ascontiguousarray(
        np.concatenate([full[:halo_w], full[halo_w + tile_w:]], axis=0))
    return w_main, w_halo


# ----------------------------------------------------------------------------
# Pallas kernel: one (tile_r, tile_w) output tile per grid step, on the MXU.
#   xl_ref : (tile_r, halo_w)  left-halo view of x   (may be clamped/ragged -> masked)
#   xm_ref : (tile_r, tile_w)  main view of x
#   xr_ref : (tile_r, halo_w)  right-halo view of x
#   wh_ref : (2*halo_w, tile_w) halo Toeplitz band   (VMEM resident)
#   wm_ref : (tile_w,  tile_w)  main Toeplitz band   (VMEM resident)
#   o_ref  : (tile_r, tile_w)  output tile
# Zero padding of the signal boundaries is realised by masking columns whose
# *assumed* global index falls outside [0, width).
# ----------------------------------------------------------------------------
def rrc_kernel(xl_ref, xm_ref, xr_ref, wh_ref, wm_ref, o_ref, *,
               tile_w: int, halo_w: int, width: int, precision):
    j = pl.program_id(1)
    base = j * tile_w

    cols_m = base + jax.lax.broadcasted_iota(jnp.int32, xm_ref.shape, 1)
    cols_l = (base - halo_w) + jax.lax.broadcasted_iota(jnp.int32, xl_ref.shape, 1)
    cols_r = (base + tile_w) + jax.lax.broadcasted_iota(jnp.int32, xr_ref.shape, 1)

    xm = jnp.where(cols_m < width, xm_ref[...], 0.0)
    xl = jnp.where((cols_l >= 0) & (cols_l < width), xl_ref[...], 0.0)
    xr = jnp.where(cols_r < width, xr_ref[...], 0.0)

    acc = jnp.dot(xm, wm_ref[...], preferred_element_type=jnp.float32,
                  precision=precision)
    halo = jnp.concatenate([xl, xr], axis=1)          # (tile_r, 2*halo_w)
    acc = acc + jnp.dot(halo, wh_ref[...], preferred_element_type=jnp.float32,
                        precision=precision)
    o_ref[...] = acc


# ----------------------------------------------------------------------------
# Wrapper: geometry / tiny-edge glue in plain JAX, correlation in Pallas.
# ----------------------------------------------------------------------------
def rrc_forward(x, h_np, *, sps: int, filter_span: int, add_pad: bool = False,
                tile_w_cap: int = 512, tile_r_cap: int = 512,
                precision=jax.lax.Precision.HIGHEST):
    n_taps = 2 * filter_span * sps + 1
    pad = sps * filter_span
    assert h_np.shape == (n_taps,)
    N, C, H, W = x.shape
    assert C == 1, "RRC conv weight has a single input channel"

    # Conv geometry (matches F.conv2d semantics of the module).
    left = (n_taps - 1) if add_pad else pad
    right = n_taps if add_pad else pad
    w_out = W + left + right - n_taps + 1

    # Lane geometry: halo covers the filter support; main tile a multiple of halo_w.
    halo_w = 128 * pl.cdiv(n_taps - 1, 128)
    tw_cap = halo_w * max(1, tile_w_cap // halo_w)
    tile_w = halo_w * max(1, min(tw_cap // halo_w, W // halo_w))

    # Row tiling: balanced multiple-of-8 tiles (minimal padding / wasted rows).
    R = N * C * H
    R_pad = 8 * pl.cdiv(R, 8)
    if R_pad <= tile_r_cap:
        tile_r = R_pad
    else:
        n_rt = pl.cdiv(R_pad, tile_r_cap)
        tile_r = 8 * pl.cdiv(pl.cdiv(R_pad, n_rt), 8)
    n_rtiles = pl.cdiv(R_pad, tile_r)
    n_wtiles = pl.cdiv(w_out, tile_w)

    # The signal stays unpadded in HBM except for (a) signals narrower than one lane
    # tile and (b) a row count that is not a multiple of 8 (both tiny copies).
    W_in = max(W, tile_w)
    w_out_alloc = max(w_out, tile_w)
    x2 = jnp.asarray(x, jnp.float32).reshape(R, W)
    if (R_pad != R) or (W_in != W):
        x2 = jnp.pad(x2, ((0, R_pad - R), (0, W_in - W)))

    w_main_np, w_halo_np = make_banded_weights(h_np, tile_w, halo_w, left)
    w_main = jnp.asarray(w_main_np)
    w_halo = jnp.asarray(w_halo_np)

    # Block index maps.  Indices are clamped so DMA starts are always in bounds;
    # whenever clamping changes an index, that block's assumed columns are fully
    # outside [0, W) and the in-kernel mask zeroes its contribution.
    r_ratio = tile_w // halo_w
    n_main_in = pl.cdiv(W_in, tile_w)
    n_halo_in = pl.cdiv(W_in, halo_w)

    def xl_map(i, j):
        return (i, jnp.clip(j * r_ratio - 1, 0, n_halo_in - 1))

    def xm_map(i, j):
        return (i, jnp.minimum(j, n_main_in - 1))

    def xr_map(i, j):
        return (i, jnp.minimum((j + 1) * r_ratio, n_halo_in - 1))

    # Advisory cost: issued MXU flops and actual HBM traffic (incl. halo re-reads).
    flops = 2 * (n_rtiles * tile_r) * (n_wtiles * tile_w) * (tile_w + 2 * halo_w)
    bytes_accessed = 4 * ((n_rtiles * tile_r) * n_wtiles * (tile_w + 2 * halo_w)   # x reads
                          + (n_rtiles * tile_r) * (n_wtiles * tile_w)              # out writes
                          + (tile_w + 2 * halo_w) * tile_w)                        # weights

    out2 = pl.pallas_call(
        functools.partial(rrc_kernel, tile_w=tile_w, halo_w=halo_w, width=W,
                          precision=precision),
        out_shape=jax.ShapeDtypeStruct((R_pad, w_out_alloc), jnp.float32),
        grid_spec=pl.GridSpec(
            grid=(n_rtiles, n_wtiles),
            in_specs=[
                pl.BlockSpec((tile_r, halo_w), xl_map),            # left halo view of x
                pl.BlockSpec((tile_r, tile_w), xm_map),            # main view of x
                pl.BlockSpec((tile_r, halo_w), xr_map),            # right halo view of x
                pl.BlockSpec((2 * halo_w, tile_w), lambda i, j: (0, 0)),  # halo taps
                pl.BlockSpec((tile_w, tile_w), lambda i, j: (0, 0)),      # main taps
            ],
            out_specs=pl.BlockSpec((tile_r, tile_w), lambda i, j: (i, j)),
        ),
        compiler_params=pltpu.CompilerParams(
            dimension_semantics=("parallel", "parallel")),
        cost_estimate=pl.CostEstimate(
            flops=flops, transcendentals=0, bytes_accessed=bytes_accessed),
    )(x2, x2, x2, w_halo, w_main)

    if (R_pad != R) or (w_out_alloc != w_out):
        out2 = out2[:R, :w_out]
    return out2.reshape(N, C, H, w_out).astype(x.dtype)


# ----------------------------------------------------------------------------
# NumPy reference (mirrors F.conv2d cross-correlation semantics)
# ----------------------------------------------------------------------------
def rrc_reference(x_np, h_np, *, sps, filter_span, add_pad=False):
    n_taps = h_np.shape[0]
    pad = sps * filter_span
    if add_pad:
        xp = np.pad(x_np, ((0, 0), (0, 0), (0, 0), (n_taps - 1, n_taps)))
    else:
        xp = np.pad(x_np, ((0, 0), (0, 0), (0, 0), (pad, pad)))
    w_out = xp.shape[-1] - n_taps + 1
    out = np.zeros(x_np.shape[:3] + (w_out,), np.float32)
    for w in range(w_out):
        out[..., w] = np.sum(xp[..., w:w + n_taps] * h_np, axis=-1)
    return out


if __name__ == "__main__":
    key1, key2 = jax.random.split(jax.random.PRNGKey(0))

    # Config 1: small taps (n_taps = 17), RadioML-style NCHW input (H=2 for I/Q).
    alpha1, sps1, span1 = 0.35, 4, 2
    h1 = get_impulse_response(alpha1, sps1, span1)
    x1 = jax.random.normal(key1, (2, 1, 2, 64), dtype=jnp.float32)

    o1 = jax.block_until_ready(
        rrc_forward(x1, h1, sps=sps1, filter_span=span1, add_pad=False))
    o1p = jax.block_until_ready(
        rrc_forward(x1, h1, sps=sps1, filter_span=span1, add_pad=True))

    r1 = rrc_reference(np.asarray(x1), h1, sps=sps1, filter_span=span1, add_pad=False)
    r1p = rrc_reference(np.asarray(x1), h1, sps=sps1, filter_span=span1, add_pad=True)
    assert o1.shape == (2, 1, 2, 64)
    assert o1p.shape == (2, 1, 2, 64 + (2 * span1 * sps1 + 1))
    np.testing.assert_allclose(np.asarray(o1), r1, rtol=1e-4, atol=1e-4)
    np.testing.assert_allclose(np.asarray(o1p), r1p, rtol=1e-4, atol=1e-4)

    # Config 2: module defaults (sps=8, filter_span=8 -> n_taps = 129) with a width
    # spanning several lane tiles, exercising halos, clamped indices and ragged edges.
    alpha2, sps2, span2 = 0.35, 8, 8
    h2 = get_impulse_response(alpha2, sps2, span2)
    x2 = jax.random.normal(key2, (2, 1, 2, 300), dtype=jnp.float32)

    o2 = jax.block_until_ready(
        rrc_forward(x2, h2, sps=sps2, filter_span=span2, add_pad=False))
    o2p = jax.block_until_ready(
        rrc_forward(x2, h2, sps=sps2, filter_span=span2, add_pad=True))

    r2 = rrc_reference(np.asarray(x2), h2, sps=sps2, filter_span=span2, add_pad=False)
    r2p = rrc_reference(np.asarray(x2), h2, sps=sps2, filter_span=span2, add_pad=True)
    assert o2.shape == r2.shape and o2p.shape == r2p.shape
    np.testing.assert_allclose(np.asarray(o2), r2, rtol=1e-4, atol=1e-4)
    np.testing.assert_allclose(np.asarray(o2p), r2p, rtol=1e-4, atol=1e-4)

    # v5e-recommended fast path: single-pass MXU precision (keeps the op memory-bound);
    # looser tolerance since f32 operands are rounded to bf16 for the MXU.
    o2d = jax.block_until_ready(
        rrc_forward(x2, h2, sps=sps2, filter_span=span2, add_pad=False,
                    precision=jax.lax.Precision.DEFAULT))
    np.testing.assert_allclose(np.asarray(o2d), r2, rtol=1e-1, atol=1e-1)

    print("KERNEL_OK")
</pallas_src>

<mosaic_0001>
module attributes {stable_mosaic.version = 11 : i64} {
  func.func @rrc_kernel(%arg0: i32, %arg1: i32, %arg2: memref<8x128xf32, #tpu.memory_space<vmem>>, %arg3: memref<8x128xf32, #tpu.memory_space<vmem>>, %arg4: memref<8x128xf32, #tpu.memory_space<vmem>>, %arg5: memref<256x128xf32, #tpu.memory_space<vmem>>, %arg6: memref<128x128xf32, #tpu.memory_space<vmem>>, %arg7: memref<8x128xf32, #tpu.memory_space<vmem>>) attributes {dimension_semantics = [#tpu.dimension_semantics<parallel>, #tpu.dimension_semantics<parallel>], iteration_bounds = array<i64: 1, 1>, scalar_prefetch = 0 : i64, scratch_operands = 0 : i64, tpu.core_type = #tpu.core_type<tc>, window_params = [{transform_indices = @transform_0, window_bounds = array<i64: 8, 128>}, {transform_indices = @transform_1, window_bounds = array<i64: 8, 128>}, {transform_indices = @transform_2, window_bounds = array<i64: 8, 128>}, {pipeline_mode = #tpu.pipeline_mode<synchronous>, transform_indices = @transform_3, window_bounds = array<i64: 256, 128>}, {pipeline_mode = #tpu.pipeline_mode<synchronous>, transform_indices = @transform_4, window_bounds = array<i64: 128, 128>}, {transform_indices = @transform_5, window_bounds = array<i64: 8, 128>}]} {
    %c128_i32 = arith.constant 128 : i32
    %0 = arith.muli %arg1, %c128_i32 : i32
    %1 = tpu.iota {dimensions = array<i32: 1>} : vector<8x128xi32>
    %2 = vector.broadcast %0 : i32 to vector<8x128xi32>
    %3 = arith.addi %2, %1 : vector<8x128xi32>
    %c128_i32_0 = arith.constant 128 : i32
    %4 = arith.subi %0, %c128_i32_0 : i32
    %5 = tpu.iota {dimensions = array<i32: 1>} : vector<8x128xi32>
    %6 = vector.broadcast %4 : i32 to vector<8x128xi32>
    %7 = arith.addi %6, %5 : vector<8x128xi32>
    %c128_i32_1 = arith.constant 128 : i32
    %8 = arith.addi %0, %c128_i32_1 : i32
    %9 = tpu.iota {dimensions = array<i32: 1>} : vector<8x128xi32>
    %10 = vector.broadcast %8 : i32 to vector<8x128xi32>
    %11 = arith.addi %10, %9 : vector<8x128xi32>
    %c64_i32 = arith.constant 64 : i32
    %12 = vector.broadcast %c64_i32 : i32 to vector<8x128xi32>
    %13 = arith.cmpi slt, %3, %12 : vector<8x128xi32>
    %c0 = arith.constant 0 : index
    %c0_2 = arith.constant 0 : index
    %14 = vector.load %arg3[%c0, %c0_2] : memref<8x128xf32, #tpu.memory_space<vmem>>, vector<8x128xf32>
    %cst = arith.constant 0.000000e+00 : f32
    %15 = vector.broadcast %cst : f32 to vector<8x128xf32>
    %16 = arith.select %13, %14, %15 : vector<8x128xi1>, vector<8x128xf32>
    %c0_i32 = arith.constant 0 : i32
    %17 = vector.broadcast %c0_i32 : i32 to vector<8x128xi32>
    %18 = arith.cmpi sge, %7, %17 : vector<8x128xi32>
    %c64_i32_3 = arith.constant 64 : i32
    %19 = vector.broadcast %c64_i32_3 : i32 to vector<8x128xi32>
    %20 = arith.cmpi slt, %7, %19 : vector<8x128xi32>
    %21 = arith.andi %18, %20 : vector<8x128xi1>
    %c0_4 = arith.constant 0 : index
    %c0_5 = arith.constant 0 : index
    %22 = vector.load %arg2[%c0_4, %c0_5] : memref<8x128xf32, #tpu.memory_space<vmem>>, vector<8x128xf32>
    %cst_6 = arith.constant 0.000000e+00 : f32
    %23 = vector.broadcast %cst_6 : f32 to vector<8x128xf32>
    %24 = arith.select %21, %22, %23 : vector<8x128xi1>, vector<8x128xf32>
    %c64_i32_7 = arith.constant 64 : i32
    %25 = vector.broadcast %c64_i32_7 : i32 to vector<8x128xi32>
    %26 = arith.cmpi slt, %11, %25 : vector<8x128xi32>
    %c0_8 = arith.constant 0 : index
    %c0_9 = arith.constant 0 : index
    %27 = vector.load %arg4[%c0_8, %c0_9] : memref<8x128xf32, #tpu.memory_space<vmem>>, vector<8x128xf32>
    %cst_10 = arith.constant 0.000000e+00 : f32
    %28 = vector.broadcast %cst_10 : f32 to vector<8x128xf32>
    %29 = arith.select %26, %27, %28 : vector<8x128xi1>, vector<8x128xf32>
    %c0_11 = arith.constant 0 : index
    %c0_12 = arith.constant 0 : index
    %30 = vector.load %arg6[%c0_11, %c0_12] : memref<128x128xf32, #tpu.memory_space<vmem>>, vector<128x128xf32>
    %cst_13 = arith.constant dense<0.000000e+00> : vector<8x128xf32>
    %31 = tpu.matmul %16, %30, %cst_13 {dimension_numbers = #tpu.dot_dimension_numbers<[1], [0], [0], [1], [0, 0, 1, 1], [], []>, precision = #tpu.contract_precision<fp32>} : vector<8x128xf32>, vector<128x128xf32>, vector<8x128xf32> -> vector<8x128xf32>
    %32 = tpu.concatenate %24, %29 in 1 : vector<8x128xf32>, vector<8x128xf32> -> vector<8x256xf32>
    %c0_14 = arith.constant 0 : index
    %c0_15 = arith.constant 0 : index
    %33 = vector.load %arg5[%c0_14, %c0_15] : memref<256x128xf32, #tpu.memory_space<vmem>>, vector<256x128xf32>
    %cst_16 = arith.constant dense<0.000000e+00> : vector<8x128xf32>
    %34 = tpu.matmul %32, %33, %cst_16 {dimension_numbers = #tpu.dot_dimension_numbers<[1], [0], [0], [1], [0, 0, 1, 1], [], []>, precision = #tpu.contract_precision<fp32>} : vector<8x256xf32>, vector<256x128xf32>, vector<8x128xf32> -> vector<8x128xf32>
    %35 = arith.addf %31, %34 : vector<8x128xf32>
    %c0_17 = arith.constant 0 : index
    %c0_18 = arith.constant 0 : index
    %36 = vector.load %arg7[%c0_17, %c0_18] : memref<8x128xf32, #tpu.memory_space<vmem>>, vector<8x128xf32>
    tpu.vector_store %arg7[%c0_17, %c0_18], %35 {strides = array<i32>} : memref<8x128xf32, #tpu.memory_space<vmem>>, vector<8x128xf32>,
    return
  }
  func.func @transform_0(%arg0: i32, %arg1: i32) -> (i32, i32) {
    %c1_i32 = arith.constant 1 : i32
    %0 = arith.muli %arg1, %c1_i32 : i32
    %c1_i32_0 = arith.constant 1 : i32
    %1 = arith.subi %0, %c1_i32_0 : i32
    %c0_i32 = arith.constant 0 : i32
    %c0_i32_1 = arith.constant 0 : i32
    %2 = arith.maxsi %c0_i32, %1 : i32
    %3 = arith.minsi %c0_i32_1, %2 : i32
    %c0_i32_2 = arith.constant 0 : i32
    return %arg0, %3 : i32, i32
  }
  func.func @transform_1(%arg0: i32, %arg1: i32) -> (i32, i32) {
    %c0_i32 = arith.constant 0 : i32
    %0 = arith.minsi %arg1, %c0_i32 : i32
    %c0_i32_0 = arith.constant 0 : i32
    return %arg0, %0 : i32, i32
  }
  func.func @transform_2(%arg0: i32, %arg1: i32) -> (i32, i32) {
    %c1_i32 = arith.constant 1 : i32
    %0 = arith.addi %arg1, %c1_i32 : i32
    %c1_i32_0 = arith.constant 1 : i32
    %1 = arith.muli %0, %c1_i32_0 : i32
    %c0_i32 = arith.constant 0 : i32
    %2 = arith.minsi %1, %c0_i32 : i32
    %c0_i32_1 = arith.constant 0 : i32
    return %arg0, %2 : i32, i32
  }
  func.func @transform_3(%arg0: i32, %arg1: i32) -> (i32, i32) {
    %c0_i32 = arith.constant 0 : i32
    %c0_i32_0 = arith.constant 0 : i32
    %c0_i32_1 = arith.constant 0 : i32
    return %c0_i32, %c0_i32_0 : i32, i32
  }
  func.func @transform_4(%arg0: i32, %arg1: i32) -> (i32, i32) {
    %c0_i32 = arith.constant 0 : i32
    %c0_i32_0 = arith.constant 0 : i32
    %c0_i32_1 = arith.constant 0 : i32
    return %c0_i32, %c0_i32_0 : i32, i32
  }
  func.func @transform_5(%arg0: i32, %arg1: i32) -> (i32, i32) {
    %c0_i32 = arith.constant 0 : i32
    return %arg0, %arg1 : i32, i32
  }
}

</mosaic_0001>

<bundles_post_ra>
// kernel: tpu_custom_call.1
= control target key start
LH: loop header
LB: loop body
LE: loop exit
PB: predicated region body
PF: predicated region fallthrough
CT: control target
= control target key end

     0   :  { %10 = vsyncpa [#allocation3], 0  ;;  %s3560_s0 = inlined_call_operand.hbm [shape: f32[8,128], index: 0, kind: input, shape index: {}]   ;;  %s3561_s1 = inlined_call_operand.hbm [shape: f32[8,128], index: 1, kind: input, shape index: {}]   ;;  %s3562_s2 = inlined_call_operand.hbm [shape: f32[8,128], index: 2, kind: input, shape index: {}]   ;;  %s3563_s3 = inlined_call_operand.hbm [shape: f32[256,128], index: 3, kind: input, shape index: {}]   ;;  %s3564_s4 = inlined_call_operand.hbm [shape: f32[128,128], index: 4, kind: input, shape index: {}]   ;;  %s3565_s5 = inlined_call_operand.hbm [shape: f32[8,128], index: 5, kind: output, shape index: {}]  }
   0x1   :  { %11 = vsyncpa [#allocation6], 0 }
   0x2   :  { %12 = vsyncpa [#allocation9], 0 }
   0x3   :  { %13 = vsyncpa [#allocation4], 0  ;;  %s2718_s18 = smov [#allocation5]   ;;  %s2719_s20 = smov [#allocation8]  }
   0x4   :  { %s37_s19 = sshll.u32 %s2718_s18, 4  ;;  %s61_s21 = sshll.u32 %s2719_s20, 4  ;;  %s38_s19 = int_to_ptr.vmem [resolvable:$true] %s37_s19  ;;  %s2759_s21 = int_to_ptr.vmem [resolvable:$true] %s61_s21 }
   0x5   :  { %s2578_s24 = scalar_lea.hbm %s3561_s1, 128 }
   0x6   :  { %p2579_p0 = scmp.ne.s32.totalorder %s3561_s1, %s2578_s24  ;;  %p2582_p1 = scmp.lt.u32.totalorder %s2578_s24, %s3561_s1 }
   0x8   :  { %p2584_p2 = pnand %p2582_p1, %p2579_p0 }
   0xa   :  { %2587 = shalt.err (!%p2584_p2)
}
   0xb   :  { %s2588_s29 = scalar_lea.vmem %s38_s19, 128  ;;  %p2593_p4 = scmp.lt.s32.totalorder %s38_s19, %s38_s19 }
   0xc   :  { %p2589_p3 = scmp.ne.s32.totalorder %s38_s19, %s2588_s29  ;;  %p2594_p5 = scmp.lt.s32.totalorder %s2588_s29, %s2588_s29 }
   0xe   :  { %p2595_p6 = por %p2594_p5, %p2593_p4 }
  0x10   :  { %p2596_p7 = pnand %p2595_p6, %p2589_p3 }
  0x12   :  { %2599 = shalt.err (!%p2596_p7)
}
  0x13   :  { %40 = dma.hbm_to_vmem [thread:$0]  %s3561_s1, 128, %s38_s19, [#allocation6]  }
  0x14   :  { %s2600_s9 = scalar_lea.hbm %s3563_s3, 4096 }
  0x15   :  { %p2601_p8 = scmp.ne.s32.totalorder %s3563_s3, %s2600_s9  ;;  %p2604_p9 = scmp.lt.u32.totalorder %s2600_s9, %s3563_s3 }
  0x17   :  { %p2606_p10 = pnand %p2604_p9, %p2601_p8 }
  0x19   :  { %2609 = shalt.err (!%p2606_p10)
}
  0x1a   :  { %s2610_s14 = scalar_lea.vmem %s2759_s21, 4096  ;;  %p2615_p12 = scmp.lt.s32.totalorder %s2759_s21, %s2759_s21 }
  0x1b   :  { %p2611_p11 = scmp.ne.s32.totalorder %s2759_s21, %s2610_s14  ;;  %p2616_p13 = scmp.lt.s32.totalorder %s2610_s14, %s2610_s14 }
  0x1d   :  { %p2617_p0 = por %p2616_p13, %p2615_p12 }
  0x1f   :  { %p2618_p1 = pnand %p2617_p0, %p2611_p11 }
  0x21   :  { %2621 = shalt.err (!%p2618_p1)
}
  0x22   :  { %s2720_s1 = smov 128   ;;  %s2721_s15 = smov 8  }
  0x23   :  { %67 = dma.hbm_to_vmem [thread:$0]  %s3563_s3, 4096, %s2759_s21, [#allocation9], %s2720_s1, %s2720_s1, %s2721_s15  }
  0x24   :  { %s2722_s18 = smov [#allocation2]   ;;  %s2723_s20 = smov [#allocation7]  }
  0x25   :  { %s27_s19 = sshll.u32 %s2722_s18, 4  ;;  %s52_s22 = sshll.u32 %s2723_s20, 4  ;;  %s28_s19 = int_to_ptr.vmem [resolvable:$true] %s27_s19  ;;  %s53_s22 = int_to_ptr.vmem [resolvable:$true] %s52_s22 }
  0x26   :  { %s2622_s25 = scalar_lea.hbm %s3560_s0, 128 }
  0x27   :  { %p2623_p2 = scmp.ne.s32.totalorder %s3560_s0, %s2622_s25  ;;  %p2626_p3 = scmp.lt.u32.totalorder %s2622_s25, %s3560_s0 }
  0x29   :  { %p2628_p4 = pnand %p2626_p3, %p2623_p2 }
  0x2b   :  { %2631 = shalt.err (!%p2628_p4)
}
  0x2c   :  { %s2632_s3 = scalar_lea.vmem %s28_s19, 128  ;;  %p2637_p6 = scmp.lt.s32.totalorder %s28_s19, %s28_s19 }
  0x2d   :  { %p2633_p5 = scmp.ne.s32.totalorder %s28_s19, %s2632_s3  ;;  %p2638_p7 = scmp.lt.s32.totalorder %s2632_s3, %s2632_s3 }
  0x2f   :  { %p2639_p8 = por %p2638_p7, %p2637_p6 }
  0x31   :  { %p2640_p9 = pnand %p2639_p8, %p2633_p5 }
  0x33   :  { %2643 = shalt.err (!%p2640_p9)
}
  0x34   :  { %30 = dma.hbm_to_vmem [thread:$0]  %s3560_s0, 128, %s28_s19, [#allocation3]  }
  0x35   :  { %s2644_s8 = scalar_lea.hbm %s3562_s2, 128 }
  0x36   :  { %p2645_p10 = scmp.ne.s32.totalorder %s3562_s2, %s2644_s8  ;;  %p2648_p11 = scmp.lt.u32.totalorder %s2644_s8, %s3562_s2 }
  0x38   :  { %p2650_p12 = pnand %p2648_p11, %p2645_p10 }
  0x3a   :  { %2653 = shalt.err (!%p2650_p12)
}
  0x3b   :  { %s2654_s13 = scalar_lea.vmem %s53_s22, 128  ;;  %p2659_p0 = scmp.lt.s32.totalorder %s53_s22, %s53_s22 }
  0x3c   :  { %p2655_p13 = scmp.ne.s32.totalorder %s53_s22, %s2654_s13  ;;  %p2660_p1 = scmp.lt.s32.totalorder %s2654_s13, %s2654_s13 }
  0x3e   :  { %p2661_p2 = por %p2660_p1, %p2659_p0 }
  0x40   :  { %p2662_p3 = pnand %p2661_p2, %p2655_p13 }
  0x42   :  { %2665 = shalt.err (!%p2662_p3)
}
  0x43   :  { %55 = dma.hbm_to_vmem [thread:$0]  %s3562_s2, 128, %s53_s22, [#allocation6]  }
  0x44   :  { %s2724_s16 = smov [#allocation10]   ;;  %s2666_s20 = scalar_lea.hbm %s3564_s4, 2048 }
  0x45   :  { %s73_s17 = sshll.u32 %s2724_s16, 4  ;;  %p2667_p4 = scmp.ne.s32.totalorder %s3564_s4, %s2666_s20  ;;  %s74_s17 = int_to_ptr.vmem [resolvable:$true] %s73_s17 }
  0x46   :  { %p2670_p5 = scmp.lt.u32.totalorder %s2666_s20, %s3564_s4 }
  0x48   :  { %p2672_p6 = pnand %p2670_p5, %p2667_p4 }
  0x4a   :  { %2675 = shalt.err (!%p2672_p6)
}
  0x4b   :  { %s2676_s27 = scalar_lea.vmem %s74_s17, 2048  ;;  %p2681_p8 = scmp.lt.s32.totalorder %s74_s17, %s74_s17 }
  0x4c   :  { %p2677_p7 = scmp.ne.s32.totalorder %s74_s17, %s2676_s27  ;;  %p2682_p9 = scmp.lt.s32.totalorder %s2676_s27, %s2676_s27 }
  0x4e   :  { %p2683_p10 = por %p2682_p9, %p2681_p8 }
  0x50   :  { %p2684_p11 = pnand %p2683_p10, %p2677_p7 }
  0x52   :  { %2687 = shalt.err (!%p2684_p11)
}
  0x53   :  { %79 = dma.hbm_to_vmem [thread:$0]  %s3564_s4, 2048, %s74_s17, [#allocation9], %s2720_s1, %s2720_s1, %s2721_s15  }
  0x54   :  { %2710 = dma.done.wait [#allocation3], 128  }
  0x55   :  { %2711 = vsyncadd [#allocation3], 4294967168 }
  0x56   :  { %2712 = dma.done.wait [#allocation6], 256  }
  0x57   :  { %2713 = vsyncadd [#allocation6], 4294967040 }
  0x58   :  { %2714 = dma.done.wait [#allocation9], 6144  }
  0x59   :  { %2715 = vsyncadd [#allocation9], 4294961152  ;;  %v3572_v0 = vmov 0.0|0.0   ;;  %v3566_v1 = vmov 0.0   ;;  %vm2727_vm0 = vmmov 0   ;;  %v104_v2 = vlaneseq  ;;  %v157_v3 = vld [vmem:[#allocation8 + $0x80] sm:$0xff] }
  0x5a   :  { %2412 = vmatprep.subr.bf16.mxu0 %v3572_v0  ;;  %274 = vmatprep.mubr.f32.mxu1 %v3566_v1  ;;  %v158_v4 = vld [vmem:[#allocation8 + $0x88] sm:$0xff]  ;;  %v125_v5 = vld [vmem:[#allocation10] sm:$0xff]  ;;  %v222_v7 = vand.u32 4294901760, %v157_v3  ;;  %v159_v16 = vld [vmem:[#allocation8 + $0x90] sm:$0xff]  ;;  %s2728_s4 = smov [#allocation11]  }
  0x5b   :  { %2042 = vmatprep.mubr.msk.f32.mxu0 %vm2727_vm0, %v3566_v1  ;;  %v2836_v6 = vand.u32 127, %v104_v2  ;;  %v225_v8 = vand.u32 4294901760, %v158_v4  ;;  %v126_v9 = vld [vmem:[#allocation10 + $0x8] sm:$0xff]  ;;  %v1036_v10 = vand.u32 4294901760, %v125_v5  ;;  %v141_v11 = vld [vmem:[#allocation8] sm:$0xff]  ;;  %v160_v17 = vld [vmem:[#allocation8 + $0x98] sm:$0xff] }
  0x5c   :  { %v142_v12 = vld [vmem:[#allocation8 + $0x8] sm:$0xff]  ;;  %v1039_v13 = vand.u32 4294901760, %v126_v9  ;;  %v174_v14 = vand.u32 4294901760, %v141_v11  ;;  %v127_v18 = vld [vmem:[#allocation10 + $0x10] sm:$0xff]  ;;  %v2840_v20 = vsub.f32 %v157_v3, %v222_v7  ;;  %v128_v23 = vld [vmem:[#allocation10 + $0x18] sm:$0xff]  ;;  %v228_v32 = vand.u32 4294901760, %v159_v16 }
  0x5d   :  { %v177_v15 = vand.u32 4294901760, %v142_v12  ;;  %v2838_v19 = vpack.c.bf16 %v225_v8, %v222_v7  ;;  %v2842_v21 = vsub.f32 %v158_v4, %v225_v8  ;;  %v2844_v22 = vsub.f32 %v125_v5, %v1036_v10  ;;  %v143_v24 = vld [vmem:[#allocation8 + $0x10] sm:$0xff]  ;;  %v144_v25 = vld [vmem:[#allocation8 + $0x18] sm:$0xff]  ;;  %v161_v30 = vld [vmem:[#allocation8 + $0xa0] sm:$0xff]  ;;  %s1683_s1 = sshll.u32 %s2728_s4, 4  ;;  %s1684_s1 = int_to_ptr.vmem [resolvable:$true] %s1683_s1 }
  0x5e   :  { %v2846_v26 = vpack.c.bf16 %v1039_v13, %v1036_v10  ;;  %v2848_v27 = vsub.f32 %v126_v9, %v1039_v13  ;;  %v2852_v29 = vsub.f32 %v141_v11, %v174_v14  ;;  %v231_v33 = vand.u32 4294901760, %v160_v17  ;;  %v162_v35 = vld [vmem:[#allocation8 + $0xa8] sm:$0xff]  ;;  %v129_v40 = vld [vmem:[#allocation10 + $0x20] sm:$0xff]  ;;  %v163_v48 = vld [vmem:[#allocation8 + $0xb0] sm:$0xff]  ;;  %s2688_s15 = scalar_lea.vmem %s1684_s1, 128  ;;  %p2693_p13 = scmp.lt.s32.totalorder %s1684_s1, %s1684_s1 }
  0x5f   :  { %3681 = vst [vmem:[#allocation16_spill] sm:$0xff] %v2838_v19  ;;  %v2850_v28 = vpack.c.bf16 %v177_v15, %v174_v14  ;;  %2221 = vmatprep.subr.bf16.mxu1 %v2838_v19  ;;  %v2855_v31 = vsub.f32 %v142_v12, %v177_v15  ;;  %v1042_v34 = vand.u32 4294901760, %v127_v18  ;;  %v1045_v36 = vand.u32 4294901760, %v128_v23  ;;  %v130_v41 = vld [vmem:[#allocation10 + $0x28] sm:$0xff]  ;;  %v145_v46 = vld [vmem:[#allocation8 + $0x20] sm:$0xff]  ;;  %v164_v53 = vld [vmem:[#allocation8 + $0xb8] sm:$0xff]  ;;  %p2689_p12 = scmp.ne.s32.totalorder %s1684_s1, %s2688_s15  ;;  %p2694_p0 = scmp.lt.s32.totalorder %s2688_s15, %s2688_s15 }
  0x60   :  { %3682 = vst [vmem:[#allocation17_spill] sm:$0xff] %v2846_v26  ;;  %3684 = vst [vmem:[#allocation19_spill] sm:$0xff] %v2852_v29  ;;  %2414 = vmatpush3.bf16.msra.mxu0 %v2846_v26  ;;  %v180_v37 = vand.u32 4294901760, %v143_v24  ;;  %v183_v38 = vand.u32 4294901760, %v144_v25  ;;  %v234_v39 = vand.u32 4294901760, %v161_v30  ;;  %v2860_v42 = vpack.c.bf16 %v231_v33, %v228_v32  ;;  %v146_v47 = vld [vmem:[#allocation8 + $0x28] sm:$0xff] }
  0x61   :  { %3683 = vst [vmem:[#allocation18_spill] sm:$0xff] %v2850_v28  ;;  %3685 = vst [vmem:[#allocation20_spill] sm:$0xff] %v2855_v31  ;;  %2223 = vmatpush3.bf16.msra.mxu1 %v2850_v28  ;;  %2415 = vmatprep.subr.bf16.mxu0 %v3572_v0  ;;  %v2862_v43 = vsub.f32 %v159_v16, %v228_v32  ;;  %v2864_v44 = vsub.f32 %v160_v17, %v231_v33  ;;  %v237_v55 = vand.u32 4294901760, %v162_v35  ;;  %v131_v62 = vld [vmem:[#allocation10 + $0x30] sm:$0xff]  ;;  %v132_v63 = vld [vmem:[#allocation10 + $0x38] sm:$0xff]  ;;  %p2695_p1 = por %p2694_p0, %p2693_p13 }
  0x62   :  { %3686 = vst [vmem:[#allocation21_spill] sm:$0xff] %v2860_v42  ;;  %v2866_v45 = vsub.f32 %v127_v18, %v1042_v34  ;;  %v2868_v49 = vpack.c.bf16 %v1045_v36, %v1042_v34  ;;  %v2870_v50 = vsub.f32 %v128_v23, %v1045_v36  ;;  %v2872_v51 = vpack.c.bf16 %v183_v38, %v180_v37  ;;  %v147_v7 = vld [vmem:[#allocation8 + $0x30] sm:$0xff]  ;;  %v148_v8 = vld [vmem:[#allocation8 + $0x38] sm:$0xff]  ;;  %v165_v9 = vld [vmem:[#allocation8 + $0xc0] sm:$0xff] }
  0x63   :  { %v2874_v52 = vsub.f32 %v143_v24, %v180_v37  ;;  %2225 = vmatprep.subr.bf16.mxu1 %v2860_v42  ;;  %v2877_v54 = vsub.f32 %v144_v25, %v183_v38  ;;  %v2879_v56 = vsub.f32 %v161_v30, %v234_v39  ;;  %v1048_v57 = vand.u32 4294901760, %v129_v40  ;;  %v166_v14 = vld [vmem:[#allocation8 + $0xc8] sm:$0xff]  ;;  %v133_v15 = vld [vmem:[#allocation10 + $0x40] sm:$0xff]  ;;  %v171_v42 = vld [vmem:[#allocation8 + $0xf0] sm:$0xff]  ;;  %p2696_p2 = pnand %p2695_p1, %p2689_p12 }
  0x64   :  { %3687 = vst [vmem:[#allocation22_spill] sm:$0xff] %v2868_v49  ;;  %3688 = vst [vmem:[#allocation23_spill] sm:$0xff] %v2872_v51  ;;  %2417 = vmatpush3.bf16.msra.mxu0 %v2868_v49  ;;  %v1051_v58 = vand.u32 4294901760, %v130_v41  ;;  %v186_v59 = vand.u32 4294901760, %v145_v46  ;;  %v189_v60 = vand.u32 4294901760, %v146_v47  ;;  %v240_v61 = vand.u32 4294901760, %v163_v48 }
  0x65   :  { %2227 = vmatpush3.bf16.msra.mxu1 %v2872_v51  ;;  %2418 = vmatprep.subr.bf16.mxu0 %v3572_v0  ;;  %v2884_v2 = vpack.c.bf16 %v237_v55, %v234_v39  ;;  %v2886_v3 = vsub.f32 %v162_v35, %v237_v55  ;;  %v2888_v4 = vsub.f32 %v129_v40, %v1048_v57  ;;  %v243_v5 = vand.u32 4294901760, %v164_v53  ;;  %v134_v16 = vld [vmem:[#allocation10 + $0x48] sm:$0xff]  ;;  %v149_v38 = vld [vmem:[#allocation8 + $0x40] sm:$0xff]  ;;  %v140_v28 = vld [vmem:[#allocation10 + $0x78] sm:$0xff] }
  0x66   :  { %v2890_v10 = vpack.c.bf16 %v1051_v58, %v1048_v57  ;;  %v2892_v11 = vsub.f32 %v130_v41, %v1051_v58  ;;  %v2894_v12 = vpack.c.bf16 %v189_v60, %v186_v59  ;;  %v2896_v13 = vsub.f32 %v145_v46, %v186_v59  ;;  %v155_v26 = vld [vmem:[#allocation8 + $0x70] sm:$0xff] }
  0x67   :  { %3689 = vst [vmem:[#allocation24_spill] sm:$0xff] %v2884_v2  ;;  %2229 = vmatprep.subr.bf16.mxu1 %v2884_v2  ;;  %v2899_v17 = vsub.f32 %v146_v47, %v189_v60  ;;  %v2901_v18 = vpack.c.bf16 %v243_v5, %v240_v61  ;;  %v2903_v23 = vsub.f32 %v163_v48, %v240_v61  ;;  %v1054_v25 = vand.u32 4294901760, %v131_v62  ;;  %v150_v47 = vld [vmem:[#allocation8 + $0x48] sm:$0xff]  ;;  %v167_v48 = vld [vmem:[#allocation8 + $0xd0] sm:$0xff]  ;;  %v136_v61 = vld [vmem:[#allocation10 + $0x58] sm:$0xff] }
  0x68   :  { %3690 = vst [vmem:[#allocation25_spill] sm:$0xff] %v2890_v10  ;;  %3691 = vst [vmem:[#allocation26_spill] sm:$0xff] %v2894_v12  ;;  %v2905_v24 = vsub.f32 %v164_v53, %v243_v5  ;;  %2420 = vmatpush3.bf16.msra.mxu0 %v2890_v10  ;;  %v1057_v30 = vand.u32 4294901760, %v132_v63  ;;  %v192_v32 = vand.u32 4294901760, %v147_v7  ;;  %v195_v33 = vand.u32 4294901760, %v148_v8  ;;  %v168_v53 = vld [vmem:[#allocation8 + $0xd8] sm:$0xff] }
  0x69   :  { %3692 = vst [vmem:[#allocation27_spill] sm:$0xff] %v2901_v18  ;;  %2231 = vmatpush3.bf16.msra.mxu1 %v2894_v12  ;;  %2421 = vmatprep.subr.bf16.mxu0 %v3572_v0  ;;  %v246_v34 = vand.u32 4294901760, %v165_v9  ;;  %v249_v35 = vand.u32 4294901760, %v166_v14  ;;  %v1060_v36 = vand.u32 4294901760, %v133_v15  ;;  %v1063_v37 = vand.u32 4294901760, %v134_v16  ;;  %v135_v60 = vld [vmem:[#allocation10 + $0x50] sm:$0xff] }
  0x6a   :  { %2233 = vmatprep.subr.bf16.mxu1 %v2901_v18  ;;  %v2911_v39 = vpack.c.bf16 %v1057_v30, %v1054_v25  ;;  %v2913_v40 = vsub.f32 %v131_v62, %v1054_v25  ;;  %v2915_v41 = vsub.f32 %v132_v63, %v1057_v30  ;;  %v2917_v46 = vpack.c.bf16 %v195_v33, %v192_v32  ;;  %v151_v5 = vld [vmem:[#allocation8 + $0x50] sm:$0xff]  ;;  %v153_v18 = vld [vmem:[#allocation8 + $0x60] sm:$0xff] }
  0x6b   :  { %v2919_v55 = vsub.f32 %v147_v7, %v192_v32  ;;  %v2921_v57 = vsub.f32 %v148_v8, %v195_v33  ;;  %v2923_v58 = vpack.c.bf16 %v249_v35, %v246_v34  ;;  %v2925_v59 = vsub.f32 %v165_v9, %v246_v34  ;;  %v152_v33 = vld [vmem:[#allocation8 + $0x58] sm:$0xff] }
  0x6c   :  { %3693 = vst [vmem:[#allocation28_spill] sm:$0xff] %v2911_v39  ;;  %3694 = vst [vmem:[#allocation29_spill] sm:$0xff] %v2917_v46  ;;  %2423 = vmatpush3.bf16.msra.mxu0 %v2911_v39  ;;  %v2929_v62 = vsub.f32 %v166_v14, %v249_v35  ;;  %v2931_v63 = vpack.c.bf16 %v1063_v37, %v1060_v36  ;;  %v2933_v25 = vsub.f32 %v133_v15, %v1060_v36  ;;  %v170_v39 = vld [vmem:[#allocation8 + $0xe8] sm:$0xff]  ;;  %v137_v15 = vld [vmem:[#allocation10 + $0x60] sm:$0xff] }
  0x6d   :  { %3695 = vst [vmem:[#allocation30_spill] sm:$0xff] %v2923_v58  ;;  %2235 = vmatpush3.bf16.msra.mxu1 %v2917_v46  ;;  %v198_v7 = vand.u32 4294901760, %v149_v38  ;;  %2424 = vmatprep.subr.bf16.mxu0 %v3572_v0  ;;  %v2937_v8 = vsub.f32 %v134_v16, %v1063_v37  ;;  %v201_v9 = vand.u32 4294901760, %v150_v47  ;;  %v252_v30 = vand.u32 4294901760, %v167_v48  ;;  %v169_v46 = vld [vmem:[#allocation8 + $0xe0] sm:$0xff] }
  0x6e   :  { %3696 = vst [vmem:[#allocation31_spill] sm:$0xff] %v2931_v63  ;;  %2237 = vmatprep.subr.bf16.mxu1 %v2923_v58  ;;  %v255_v32 = vand.u32 4294901760, %v168_v53  ;;  %v1066_v1 = vand.u32 4294901760, %v135_v60  ;;  %v1069_v14 = vand.u32 4294901760, %v136_v61  ;;  %v204_v35 = vand.u32 4294901760, %v151_v5  ;;  %v138_v58 = vld [vmem:[#allocation10 + $0x68] sm:$0xff] }
  0x6f   :  { %v2939_v34 = vsub.f32 %v149_v38, %v198_v7  ;;  %vm114_vm1 = vcmp.lt.s32.totalorder %v2836_v6, 64  ;;  %v2942_v36 = vpack.c.bf16 %v201_v9, %v198_v7  ;;  %v2944_v0 = vsub.f32 %v150_v47, %v201_v9  ;;  %v154_v38 = vld [vmem:[#allocation8 + $0x68] sm:$0xff] }
  0x70   :  { %v2946_v16 = vpack.c.bf16 %v255_v32, %v252_v30  ;;  %v2948_v37 = vsub.f32 %v167_v48, %v252_v30  ;;  %2426 = vmatpush3.bf16.msra.mxu0 %v2931_v63  ;;  %v2951_v12 = vsub.f32 %v168_v53, %v255_v32  ;;  %v2953_v10 = vpack.c.bf16 %v1069_v14, %v1066_v1 }
  0x71   :  { %3697 = vst [vmem:[#allocation32_spill] sm:$0xff] %v2942_v36  ;;  %3698 = vst [vmem:[#allocation33_spill] sm:$0xff] %v2944_v0  ;;  %v2955_v2 = vsub.f32 %v135_v60, %v1066_v1  ;;  %v2957_v51 = vsub.f32 %v136_v61, %v1069_v14  ;;  %2239 = vmatpush3.bf16.msra.mxu1 %v2942_v36  ;;  %v3703_v47 = vmov 0.0|0.0   ;;  %v207_v7 = vand.u32 4294901760, %v152_v33  ;;  %v172_v1 = vld [vmem:[#allocation8 + $0xf8] sm:$0xff] }
  0x72   :  { %3699 = vst [vmem:[#allocation34_spill] sm:$0xff] %v2946_v16  ;;  %3700 = vst [vmem:[#allocation35_spill] sm:$0xff] %v2951_v12  ;;  %2427 = vmatprep.subr.bf16.mxu0 %v3703_v47  ;;  %v2961_v48 = vsub.f32 %v151_v5, %v204_v35  ;;  %v258_v9 = vand.u32 4294901760, %v169_v46  ;;  %v261_v30 = vand.u32 4294901760, %v170_v39  ;;  %2241 = vmatprep.subr.bf16.mxu1 %v2946_v16  ;;  %v1072_v63 = vand.u32 4294901760, %v137_v15  ;;  %v139_v5 = vld [vmem:[#allocation10 + $0x70] sm:$0xff] }
  0x73   :  { %3701 = vst [vmem:[#allocation36_spill] sm:$0xff] %v2953_v10  ;;  %3702 = vst [vmem:[#allocation37_spill] sm:$0xff] %v2957_v51  ;;  %v1075_v53 = vand.u32 4294901760, %v138_v58  ;;  %v210_v32 = vand.u32 4294901760, %v153_v18  ;;  %v213_v49 = vand.u32 4294901760, %v154_v38  ;;  %v2964_v60 = vpack.c.bf16 %v207_v7, %v204_v35  ;;  %v156_v35 = vld [vmem:[#allocation8 + $0x78] sm:$0xff] }
  0x74   :  { %3704 = vst [vmem:[#allocation38_spill] sm:$0xff] %v2961_v48  ;;  %v2966_v61 = vsub.f32 %v152_v33, %v207_v7  ;;  %v2968_v14 = vpack.c.bf16 %v261_v30, %v258_v9  ;;  %v2970_v36 = vsub.f32 %v169_v46, %v258_v9  ;;  %2429 = vmatpush3.bf16.msra.mxu0 %v2953_v10  ;;  %v264_v9 = vand.u32 4294901760, %v171_v42 }
  0x75   :  { %3705 = vst [vmem:[#allocation39_spill] sm:$0xff] %v2964_v60  ;;  %v2973_v16 = vsub.f32 %v170_v39, %v261_v30  ;;  %v2975_v19 = vpack.c.bf16 %v1075_v53, %v1072_v63  ;;  %v2977_v48 = vsub.f32 %v137_v15, %v1072_v63  ;;  %v2979_v51 = vsub.f32 %v138_v58, %v1075_v53  ;;  %v115_v58 = vld [vmem:[#allocation5] sm:$0xff] }
  0x76   :  { %3706 = vst [vmem:[#allocation40_spill] sm:$0xff] %v2968_v14  ;;  %2243 = vmatpush3.bf16.msra.mxu1 %v2964_v60  ;;  %2430 = vmatprep.subr.bf16.mxu0 %v3703_v47  ;;  %v2983_v46 = vpack.c.bf16 %v213_v49, %v210_v32  ;;  %v2985_v33 = vsub.f32 %v153_v18, %v210_v32  ;;  %v267_v39 = vand.u32 4294901760, %v172_v1  ;;  %v1078_v30 = vand.u32 4294901760, %v139_v5 }
  0x77   :  { %3707 = vst [vmem:[#allocation41_spill] sm:$0xff] %v2975_v19  ;;  %3708 = vst [vmem:[#allocation42_spill] sm:$0xff] %v2979_v51  ;;  %v2987_v7 = vsub.f32 %v154_v38, %v213_v49  ;;  %2245 = vmatprep.subr.bf16.mxu1 %v2968_v14  ;;  %v1081_v63 = vand.u32 4294901760, %v140_v28  ;;  %v216_v15 = vand.u32 4294901760, %v155_v26  ;;  %v2990_v53 = vsub.f32 %v171_v42, %v264_v9 }
  0x78   :  { %3709 = vst [vmem:[#allocation43_spill] sm:$0xff] %v2983_v46  ;;  %v219_v10 = vand.u32 4294901760, %v156_v35  ;;  %v3611_v51 = vand.u32 4294901760, %v2842_v21  ;;  %2432 = vmatpush3.bf16.msra.mxu0 %v2975_v19  ;;  %v2995_v18 = vpack.c.bf16 %v267_v39, %v264_v9  ;;  %v2997_v49 = vsub.f32 %v172_v1, %v267_v39 }
  0x79   :  { %v2999_v38 = vpack.c.bf16 %v1081_v63, %v1078_v30  ;;  %v3001_v32 = vsub.f32 %v139_v5, %v1078_v30  ;;  %2433 = vmatprep.subr.bf16.mxu0 %v3703_v47  ;;  %v3005_v42 = vsub.f32 %v140_v28, %v1081_v63  ;;  %v3009_v60 = vsub.f32 %v155_v26, %v216_v15 }
  0x7a   :  { %3710 = vst [vmem:[#allocation44_spill] sm:$0xff] %v2995_v18  ;;  %2247 = vmatpush3.bf16.msra.mxu1 %v2983_v46  ;;  %v3007_v14 = vpack.c.bf16 %v219_v10, %v216_v15  ;;  %v116_v9 = vsel %vm114_vm1, %v115_v58, 0.0  ;;  %v3014_v1 = vsub.f32 %v156_v35, %v219_v10  ;;  %v3714_v5 = vand.u32 4294901760, %v2840_v20 }
  0x7b   :  { %3711 = vst [vmem:[#allocation45_spill] sm:$0xff] %v2999_v38  ;;  %3712 = vst [vmem:[#allocation46_spill] sm:$0xff] %v3005_v42  ;;  %2249 = vmatprep.subr.bf16.mxu1 %v2995_v18  ;;  %v408_v28 = vsub.f32 %v2842_v21, %v3611_v51  ;;  %v3022_v30 = vand.u32 4294901760, %v116_v9  ;;  %v3618_v26 = vand.u32 4294901760, %v2844_v22  ;;  %v3623_v63 = vand.u32 4294901760, %v2848_v27 }
  0x7c   :  { %3713 = vst [vmem:[#allocation47_spill] sm:$0xff] %v3007_v14  ;;  %v401_v39 = vsub.f32 %v2840_v20, %v3714_v5  ;;  %v3624_v6 = vand.u32 4294901760, %v2852_v29  ;;  %2435 = vmatpush3.bf16.msra.mxu0 %v2999_v38  ;;  %v3718_v18 = vand.u32 4294901760, %v2862_v43 }
  0x7d   :  { %3715 = vst [vmem:[#allocation48_spill] sm:$0xff] %v3022_v30  ;;  %v409_v35 = vand.u32 4294901760, %v408_v28  ;;  %v3030_v58 = vsub.f32 %v116_v9, %v3022_v30  ;;  %2436 = vmatprep.subr.bf16.mxu0 %v3703_v47  ;;  %v1130_v51 = vsub.f32 %v2844_v22, %v3618_v26  ;;  %v1137_v15 = vsub.f32 %v2848_v27, %v3623_v63 }
  0x7e   :  { %v402_v10 = vand.u32 4294901760, %v401_v39  ;;  %2251 = vmatpush3.bf16.msra.mxu1 %v3007_v14  ;;  %v289_v39 = vsub.f32 %v2852_v29, %v3624_v6  ;;  %v3631_v9 = vand.u32 4294901760, %v2864_v44  ;;  %v3717_v14 = vand.u32 4294901760, %v2855_v31 }
  0x7f   :  { %3716 = vst [vmem:[#allocation49_spill] sm:$0xff] %v3030_v58  ;;  %v3632_v5 = vand.u32 4294901760, %v3030_v58  ;;  %v415_v26 = vsub.f32 %v2862_v43, %v3718_v18  ;;  %v1131_v46 = vand.u32 4294901760, %v1130_v51  ;;  %v1138_v19 = vand.u32 4294901760, %v1137_v15 }
  0x80   :  { %v2252_v28 = vpack.c.bf16 %v409_v35, %v402_v10  ;;  %v296_v38 = vsub.f32 %v2855_v31, %v3717_v14  ;;  %v290_v63 = vand.u32 4294901760, %v289_v39  ;;  %v422_v6 = vsub.f32 %v2864_v44, %v3631_v9 }
  0x81   :  { %v3719_v30 = vmov 0.0   ;;  %v1119_v10 = vsub.f32 %v3030_v58, %v3632_v5  ;;  %v416_v14 = vand.u32 4294901760, %v415_v26  ;;  %v3639_v31 = vand.u32 4294901760, %v2866_v45 }
  0x82   :  { %280 = vmatmul.mubr.f32.vlgmr.msra.gmra.mrb[0].mxu1 %v3719_v30  ;;  %2253 = vmatprep.subr.bf16.mxu1 %v2252_v28  ;;  %v297_v35 = vand.u32 4294901760, %v296_v38  ;;  %v2437_v29 = vpack.c.bf16 %v1138_v19, %v1131_v46  ;;  %v423_v18 = vand.u32 4294901760, %v422_v6  ;;  %v3636_v51 = vand.u32 4294901760, %v2870_v50 }
  0x83   :  { %v3633_v15 = vand.u32 4294901760, %v2874_v52  ;;  %510 = vmatprep.mubr.f32.mxu1 %v3719_v30  ;;  %v1120_v39 = vand.u32 4294901760, %v1119_v10  ;;  %v1144_v28 = vsub.f32 %v2866_v45, %v3639_v31  ;;  %v3635_v5 = vand.u32 4294901760, %v2877_v54 }
  0x84   :  { %v2254_v9 = vpack.c.bf16 %v297_v35, %v290_v63  ;;  %v2256_v38 = vpack.c.bf16 %v423_v18, %v416_v14  ;;  %v1151_v19 = vsub.f32 %v2870_v50, %v3636_v51  ;;  %v3634_v26 = vand.u32 4294901760, %v2879_v56 }
  0x85   :  { %v303_v46 = vsub.f32 %v2874_v52, %v3633_v15  ;;  %2043 = vmatmul.mubr.f32.vlgmr.msra.gmra.mrb[0].mxu0 %v1120_v39  ;;  %v1145_v63 = vand.u32 4294901760, %v1144_v28  ;;  %v310_v6 = vsub.f32 %v2877_v54, %v3635_v5  ;;  %v3637_v10 = vand.u32 4294901760, %v2886_v3 }
  0x86   :  { %2255 = vmatpush3.bf16.msra.mxu1 %v2254_v9  ;;  %v3638_v35 = vand.u32 4294901760, %v2888_v4  ;;  %2438 = vmatpush3.bf16.msra.mxu0 %v2437_v29  ;;  %v1152_v14 = vand.u32 4294901760, %v1151_v19  ;;  %v429_v15 = vsub.f32 %v2879_v56, %v3634_v26  ;;  %v3646_v39 = vand.u32 4294901760, %v2892_v11 }
  0x87   :  { %2257 = vmatprep.subr.bf16.mxu1 %v2256_v38  ;;  %v304_v18 = vand.u32 4294901760, %v303_v46  ;;  %2439 = vmatprep.subr.bf16.mxu0 %v3703_v47  ;;  %v311_v9 = vand.u32 4294901760, %v310_v6  ;;  %v436_v28 = vsub.f32 %v2886_v3, %v3637_v10  ;;  %v3640_v38 = vand.u32 4294901760, %v2896_v13 }
  0x88   :  { %v1158_v29 = vsub.f32 %v2888_v4, %v3638_v35  ;;  %2077 = vmatprep.mubr.msk.f32.mxu0 %vm2727_vm0, %v3719_v30  ;;  %v2440_v19 = vpack.c.bf16 %v1152_v14, %v1145_v63  ;;  %v430_v46 = vand.u32 4294901760, %v429_v15  ;;  %v1165_v26 = vsub.f32 %v2892_v11, %v3646_v39 }
  0x89   :  { %v3641_v6 = vand.u32 4294901760, %v2899_v17  ;;  %v2258_v5 = vpack.c.bf16 %v311_v9, %v304_v18  ;;  %v437_v51 = vand.u32 4294901760, %v436_v28  ;;  %v317_v35 = vsub.f32 %v2896_v13, %v3640_v38 }
  0x8a   :  { %v1159_v10 = vand.u32 4294901760, %v1158_v29  ;;  %2441 = vmatpush3.bf16.msra.mxu0 %v2440_v19  ;;  %v1166_v31 = vand.u32 4294901760, %v1165_v26  ;;  %v3642_v15 = vand.u32 4294901760, %v2903_v23  ;;  %v3643_v14 = vand.u32 4294901760, %v2905_v24 }
  0x8b   :  { %v324_v63 = vsub.f32 %v2899_v17, %v3641_v6  ;;  %2259 = vmatpush3.bf16.msra.mxu1 %v2258_v5  ;;  %2442 = vmatprep.subr.bf16.mxu0 %v3703_v47  ;;  %v2260_v18 = vpack.c.bf16 %v437_v51, %v430_v46  ;;  %v318_v9 = vand.u32 4294901760, %v317_v35  ;;  %v3644_v28 = vand.u32 4294901760, %v2913_v40 }
  0x8c   :  { %v3645_v29 = vand.u32 4294901760, %v2915_v41  ;;  %v2443_v38 = vpack.c.bf16 %v1166_v31, %v1159_v10  ;;  %v443_v26 = vsub.f32 %v2903_v23, %v3642_v15  ;;  %v450_v6 = vsub.f32 %v2905_v24, %v3643_v14 }
  0x8d   :  { %v325_v19 = vand.u32 4294901760, %v324_v63  ;;  %2261 = vmatprep.subr.bf16.mxu1 %v2260_v18  ;;  %v1172_v5 = vsub.f32 %v2913_v40, %v3644_v28  ;;  %v3647_v31 = vand.u32 4294901760, %v2919_v55  ;;  %v3653_v10 = vand.u32 4294901760, %v2921_v57 }
  0x8e   :  { %v1179_v51 = vsub.f32 %v2915_v41, %v3645_v29  ;;  %2444 = vmatpush3.bf16.msra.mxu0 %v2443_v38  ;;  %v444_v46 = vand.u32 4294901760, %v443_v26  ;;  %v451_v63 = vand.u32 4294901760, %v450_v6  ;;  %v3648_v15 = vand.u32 4294901760, %v2925_v59 }
  0x8f   :  { %v2262_v35 = vpack.c.bf16 %v325_v19, %v318_v9  ;;  %2445 = vmatprep.subr.bf16.mxu0 %v3703_v47  ;;  %v1173_v18 = vand.u32 4294901760, %v1172_v5  ;;  %v331_v28 = vsub.f32 %v2919_v55, %v3647_v31  ;;  %v338_v29 = vsub.f32 %v2921_v57, %v3653_v10 }
  0x90   :  { %v1180_v14 = vand.u32 4294901760, %v1179_v51  ;;  %v2264_v39 = vpack.c.bf16 %v451_v63, %v444_v46  ;;  %v457_v38 = vsub.f32 %v2925_v59, %v3648_v15  ;;  %v3652_v6 = vand.u32 4294901760, %v2929_v62 }
  0x91   :  { %2263 = vmatpush3.bf16.msra.mxu1 %v2262_v35  ;;  %v3649_v9 = vand.u32 4294901760, %v2933_v25  ;;  %v332_v26 = vand.u32 4294901760, %v331_v28  ;;  %v339_v5 = vand.u32 4294901760, %v338_v29  ;;  %v3650_v51 = vand.u32 4294901760, %v2937_v8 }
  0x92   :  { %v2446_v19 = vpack.c.bf16 %v1180_v14, %v1173_v18  ;;  %2265 = vmatprep.subr.bf16.mxu1 %v2264_v39  ;;  %v458_v31 = vand.u32 4294901760, %v457_v38  ;;  %v464_v35 = vsub.f32 %v2929_v62, %v3652_v6  ;;  %v3651_v63 = vand.u32 4294901760, %v2939_v34  ;;  %v3720_v6 = vld [vmem:[#allocation37_spill] sm:$0xff] }
  0x93   :  { %v1186_v46 = vsub.f32 %v2933_v25, %v3649_v9  ;;  %v2266_v15 = vpack.c.bf16 %v339_v5, %v332_v26  ;;  %v1193_v14 = vsub.f32 %v2937_v8, %v3650_v51  ;;  %v3656_v28 = vand.u32 4294901760, %v2944_v0 }
  0x94   :  { %2447 = vmatpush3.bf16.msra.mxu0 %v2446_v19  ;;  %v3659_v39 = vand.u32 4294901760, %v2948_v37  ;;  %v465_v29 = vand.u32 4294901760, %v464_v35  ;;  %v345_v38 = vsub.f32 %v2939_v34, %v3651_v63  ;;  %v3660_v9 = vand.u32 4294901760, %v2951_v12 }
  0x95   :  { %2448 = vmatprep.subr.bf16.mxu0 %v3703_v47  ;;  %v1187_v18 = vand.u32 4294901760, %v1186_v46  ;;  %2267 = vmatpush3.bf16.msra.mxu1 %v2266_v15  ;;  %v1194_v19 = vand.u32 4294901760, %v1193_v14  ;;  %v352_v26 = vsub.f32 %v2944_v0, %v3656_v28  ;;  %v3668_v51 = vand.u32 4294901760, %v2955_v2 }
  0x96   :  { %v471_v5 = vsub.f32 %v2948_v37, %v3659_v39  ;;  %v2268_v35 = vpack.c.bf16 %v465_v29, %v458_v31  ;;  %v346_v46 = vand.u32 4294901760, %v345_v38  ;;  %v478_v63 = vsub.f32 %v2951_v12, %v3660_v9  ;;  %v3721_v29 = vld [vmem:[#allocation38_spill] sm:$0xff] }
  0x97   :  { %v3664_v10 = vand.u32 4294901760, %v3720_v6  ;;  %v2449_v15 = vpack.c.bf16 %v1194_v19, %v1187_v18  ;;  %v353_v14 = vand.u32 4294901760, %v352_v26  ;;  %v1200_v28 = vsub.f32 %v2955_v2, %v3668_v51 }
  0x98   :  { %v472_v58 = vand.u32 4294901760, %v471_v5  ;;  %2269 = vmatprep.subr.bf16.mxu1 %v2268_v35  ;;  %v479_v0 = vand.u32 4294901760, %v478_v63  ;;  %v3663_v38 = vand.u32 4294901760, %v3721_v29  ;;  %v3665_v39 = vand.u32 4294901760, %v2966_v61 }
  0x99   :  { %v1207_v31 = vsub.f32 %v3720_v6, %v3664_v10  ;;  %2450 = vmatpush3.bf16.msra.mxu0 %v2449_v15  ;;  %v2270_v9 = vpack.c.bf16 %v353_v14, %v346_v46  ;;  %v1201_v12 = vand.u32 4294901760, %v1200_v28  ;;  %v3666_v18 = vand.u32 4294901760, %v2970_v36 }
  0x9a   :  { %v3667_v19 = vand.u32 4294901760, %v2973_v16  ;;  %2451 = vmatprep.subr.bf16.mxu0 %v3703_v47  ;;  %v2272_v26 = vpack.c.bf16 %v479_v0, %v472_v58  ;;  %v359_v63 = vsub.f32 %v3721_v29, %v3663_v38  ;;  %v366_v35 = vsub.f32 %v2966_v61, %v3665_v39  ;;  %v3722_v58 = vld [vmem:[#allocation42_spill] sm:$0xff] }
  0x9b   :  { %v1208_v5 = vand.u32 4294901760, %v1207_v31  ;;  %2271 = vmatpush3.bf16.msra.mxu1 %v2270_v9  ;;  %v485_v28 = vsub.f32 %v2970_v36, %v3666_v18  ;;  %v3669_v0 = vand.u32 4294901760, %v2977_v48  ;;  %v3675_v15 = vand.u32 4294901760, %v3722_v58 }
  0x9c   :  { %v492_v46 = vsub.f32 %v2973_v16, %v3667_v19  ;;  %2273 = vmatprep.subr.bf16.mxu1 %v2272_v26  ;;  %v360_v31 = vand.u32 4294901760, %v359_v63  ;;  %v367_v38 = vand.u32 4294901760, %v366_v35  ;;  %v3670_v10 = vand.u32 4294901760, %v2985_v33 }
  0x9d   :  { %v2452_v14 = vpack.c.bf16 %v1208_v5, %v1201_v12  ;;  %v486_v39 = vand.u32 4294901760, %v485_v28  ;;  %v1214_v18 = vsub.f32 %v2977_v48, %v3669_v0  ;;  %v1221_v19 = vsub.f32 %v3722_v58, %v3675_v15 }
  0x9e   :  { %v493_v9 = vand.u32 4294901760, %v492_v46  ;;  %v2274_v51 = vpack.c.bf16 %v367_v38, %v360_v31  ;;  %v373_v12 = vsub.f32 %v2985_v33, %v3670_v10  ;;  %v3672_v26 = vand.u32 4294901760, %v2987_v7 }
  0x9f   :  { %2453 = vmatpush3.bf16.msra.mxu0 %v2452_v14  ;;  %v3671_v5 = vand.u32 4294901760, %v2990_v53  ;;  %v1215_v35 = vand.u32 4294901760, %v1214_v18  ;;  %v1222_v28 = vand.u32 4294901760, %v1221_v19  ;;  %v3674_v46 = vand.u32 4294901760, %v2997_v49 }
  0xa0   :  { %2454 = vmatprep.subr.bf16.mxu0 %v3703_v47  ;;  %v2276_v63 = vpack.c.bf16 %v493_v9, %v486_v39  ;;  %2275 = vmatpush3.bf16.msra.mxu1 %v2274_v51  ;;  %v374_v0 = vand.u32 4294901760, %v373_v12  ;;  %v380_v38 = vsub.f32 %v2987_v7, %v3672_v26  ;;  %v3673_v31 = vand.u32 4294901760, %v3001_v32 }
  0xa1   :  { %v499_v14 = vsub.f32 %v2990_v53, %v3671_v5  ;;  %v2455_v10 = vpack.c.bf16 %v1222_v28, %v1215_v35  ;;  %v506_v39 = vsub.f32 %v2997_v49, %v3674_v46  ;;  %v3676_v18 = vand.u32 4294901760, %v3005_v42 }
  0xa2   :  { %2277 = vmatprep.subr.bf16.mxu1 %v2276_v63  ;;  %v3680_v51 = vand.u32 4294901760, %v3009_v60  ;;  %v381_v19 = vand.u32 4294901760, %v380_v38  ;;  %v1228_v12 = vsub.f32 %v3001_v32, %v3673_v31  ;;  %v3679_v5 = vand.u32 4294901760, %v3014_v1 }
  0xa3   :  { %v500_v9 = vand.u32 4294901760, %v499_v14  ;;  %2456 = vmatpush3.bf16.msra.mxu0 %v2455_v10  ;;  %v507_v26 = vand.u32 4294901760, %v506_v39  ;;  %v1235_v63 = vsub.f32 %v3005_v42, %v3676_v18  ;;  %v2284_v18 = vpack.c.bf16 %v2842_v21, %v2840_v20 }
  0xa4   :  { %v387_v35 = vsub.f32 %v3009_v60, %v3680_v51  ;;  %v2278_v28 = vpack.c.bf16 %v381_v19, %v374_v0  ;;  %2457 = vmatprep.subr.bf16.mxu0 %v3703_v47  ;;  %v1229_v38 = vand.u32 4294901760, %v1228_v12  ;;  %v394_v14 = vsub.f32 %v3014_v1, %v3679_v5  ;;  %v3723_v19 = vld [vmem:[#allocation19_spill] sm:$0xff]  ;;  %v3724_v12 = vld [vmem:[#allocation20_spill] sm:$0xff] }
  0xa5   :  { %v2280_v31 = vpack.c.bf16 %v507_v26, %v500_v9  ;;  %v1236_v46 = vand.u32 4294901760, %v1235_v63  ;;  %v2461_v0 = vpack.c.bf16 %v2848_v27, %v2844_v22  ;;  %v2286_v26 = vpack.c.bf16 %v3724_v12, %v3723_v19  ;;  %v3725_v63 = vld [vmem:[#allocation48_spill] sm:$0xff] }
  0xa6   :  { %v388_v10 = vand.u32 4294901760, %v387_v35  ;;  %2279 = vmatpush3.bf16.msra.mxu1 %v2278_v28  ;;  %v395_v39 = vand.u32 4294901760, %v394_v14  ;;  %v2288_v9 = vpack.c.bf16 %v2864_v44, %v2862_v43  ;;  %v2294_v35 = vpack.c.bf16 %v2899_v17, %v2896_v13 }
  0xa7   :  { %2281 = vmatprep.subr.bf16.mxu1 %v2280_v31  ;;  %v2458_v15 = vpack.c.bf16 %v1236_v46, %v1229_v38  ;;  %v2464_v46 = vpack.c.bf16 %v2870_v50, %v2866_v45  ;;  %v2290_v31 = vpack.c.bf16 %v2877_v54, %v2874_v52  ;;  %v3726_v28 = vand.u32 4294901760, %v2840_v20 }
  0xa8   :  { %v2282_v42 = vpack.c.bf16 %v395_v39, %v388_v10  ;;  %v3728_v14 = vand.u32 4294901760, %v2844_v22  ;;  %v3729_v10 = vand.u32 4294901760, %v2848_v27  ;;  %v3730_v5 = vand.u32 4294901760, %v3723_v19 }
  0xa9   :  { %2459 = vmatpush3.bf16.msra.mxu0 %v2458_v15  ;;  %v2292_v15 = vpack.c.bf16 %v2886_v3, %v2879_v56  ;;  %v3731_v51 = vand.u32 4294901760, %v3724_v12  ;;  %v3732_v20 = vand.u32 4294901760, %v2862_v43  ;;  %v3734_v22 = vand.u32 4294901760, %v2866_v45 }
  0xaa   :  { %2283 = vmatpush3.bf16.msra.mxu1 %v2282_v42  ;;  %2460 = vmatprep.subr.bf16.mxu0 %v3703_v47  ;;  %v2467_v42 = vpack.c.bf16 %v2892_v11, %v2888_v4  ;;  %v3259_v39 = vpack.c.bf16 %v3729_v10, %v3728_v14  ;;  %v3735_v27 = vand.u32 4294901760, %v2870_v50  ;;  %v3736_v19 = vand.u32 4294901760, %v2874_v52 }
  0xab   :  { %2285 = vmatprep.subr.bf16.mxu1 %v2284_v18  ;;  %v3727_v18 = vand.u32 4294901760, %v2842_v21  ;;  %v3733_v21 = vand.u32 4294901760, %v2864_v44  ;;  %v3738_v43 = vand.u32 4294901760, %v2879_v56  ;;  %v3739_v44 = vand.u32 4294901760, %v2886_v3 }
  0xac   :  { %2078 = vmatmul.mubr.f32.vlgmr.msra.gmra.mrb[0].mxu0 %v3725_v63  ;;  %v3265_v63 = vpack.c.bf16 %v3731_v51, %v3730_v5  ;;  %v3737_v5 = vand.u32 4294901760, %v2877_v54  ;;  %v3740_v45 = vand.u32 4294901760, %v2888_v4  ;;  %v3741_v50 = vand.u32 4294901760, %v2892_v11 }
  0xad   :  { %v3253_v38 = vpack.c.bf16 %v3727_v18, %v3726_v28  ;;  %512 = vmatmul.mubr.f32.vlgmr.msra.gmra.mrb[2].mxu1 %v3719_v30  ;;  %2462 = vmatpush3.bf16.msra.mxu0 %v2461_v0  ;;  %v3272_v28 = vpack.c.bf16 %v3733_v21, %v3732_v20  ;;  %v3278_v18 = vpack.c.bf16 %v3735_v27, %v3734_v22  ;;  %v3742_v52 = vand.u32 4294901760, %v2896_v13 }
  0xae   :  { %v3284_v51 = vpack.c.bf16 %v3737_v5, %v3736_v19  ;;  %2287 = vmatpush3.bf16.msra.mxu1 %v2286_v26  ;;  %2463 = vmatprep.subr.bf16.mxu0 %v3703_v47  ;;  %v3291_v0 = vpack.c.bf16 %v3739_v44, %v3738_v43  ;;  %v3297_v12 = vpack.c.bf16 %v3741_v50, %v3740_v45  ;;  %v3743_v54 = vand.u32 4294901760, %v2899_v17  ;;  %v3755_v44 = vld [vmem:[#allocation33_spill] sm:$0xff] }
  0xaf   :  { %2289 = vmatprep.subr.bf16.mxu1 %v2288_v9  ;;  %647 = vmatprep.mubr.f32.mxu1 %v3719_v30  ;;  %v3744_v56 = vand.u32 4294901760, %v2903_v23  ;;  %v3745_v3 = vand.u32 4294901760, %v2905_v24  ;;  %v3746_v4 = vand.u32 4294901760, %v2913_v40  ;;  %v3747_v11 = vand.u32 4294901760, %v2915_v41 }
  0xb0   :  { %v3303_v14 = vpack.c.bf16 %v3743_v54, %v3742_v52  ;;  %v3748_v13 = vand.u32 4294901760, %v2919_v55  ;;  %v3749_v17 = vand.u32 4294901760, %v2921_v57  ;;  %2112 = vmatprep.mubr.msk.f32.mxu0 %vm2727_vm0, %v3719_v30  ;;  %v3750_v9 = vand.u32 4294901760, %v2925_v59  ;;  %v3758_v54 = vld [vmem:[#allocation35_spill] sm:$0xff] }
  0xb1   :  { %v3310_v26 = vpack.c.bf16 %v3745_v3, %v3744_v56  ;;  %v3316_v10 = vpack.c.bf16 %v3747_v11, %v3746_v4  ;;  %v3751_v21 = vand.u32 4294901760, %v2929_v62  ;;  %v3752_v27 = vand.u32 4294901760, %v2933_v25  ;;  %2465 = vmatpush3.bf16.msra.mxu0 %v2464_v46 }
  0xb2   :  { %v3322_v20 = vpack.c.bf16 %v3749_v17, %v3748_v13  ;;  %v3753_v19 = vand.u32 4294901760, %v2937_v8  ;;  %v3754_v43 = vand.u32 4294901760, %v2939_v34  ;;  %v3756_v45 = vand.u32 4294901760, %v3755_v44  ;;  %2291 = vmatpush3.bf16.msra.mxu1 %v2290_v31  ;;  %2466 = vmatprep.subr.bf16.mxu0 %v3703_v47 }
  0xb3   :  { %v3330_v22 = vpack.c.bf16 %v3751_v21, %v3750_v9  ;;  %v3757_v52 = vand.u32 4294901760, %v2948_v37  ;;  %v3759_v56 = vand.u32 4294901760, %v3758_v54  ;;  %v3760_v4 = vand.u32 4294901760, %v2955_v2  ;;  %2293 = vmatprep.subr.bf16.mxu1 %v2292_v15  ;;  %v3794_v15 = vld [vmem:[#allocation32_spill] sm:$0xff] }
  0xb4   :  { %v3336_v5 = vpack.c.bf16 %v3753_v19, %v3752_v27  ;;  %v3342_v50 = vpack.c.bf16 %v3756_v45, %v3754_v43  ;;  %v3761_v11 = vand.u32 4294901760, %v3720_v6  ;;  %v3762_v17 = vand.u32 4294901760, %v3721_v29 }
  0xb5   :  { %v3348_v3 = vpack.c.bf16 %v3759_v56, %v3757_v52  ;;  %v3763_v9 = vand.u32 4294901760, %v2966_v61  ;;  %v3764_v27 = vand.u32 4294901760, %v2970_v36  ;;  %v3765_v19 = vand.u32 4294901760, %v2973_v16  ;;  %2468 = vmatpush3.bf16.msra.mxu0 %v2467_v42  ;;  %v3795_v42 = vld [vmem:[#allocation34_spill] sm:$0xff] }
  0xb6   :  { %v3354_v13 = vpack.c.bf16 %v3761_v11, %v3760_v4  ;;  %v3767_v46 = vand.u32 4294901760, %v2977_v48  ;;  %v3768_v45 = vand.u32 4294901760, %v3722_v58  ;;  %v3770_v56 = vand.u32 4294901760, %v2985_v33  ;;  %2295 = vmatpush3.bf16.msra.mxu1 %v2294_v35  ;;  %2469 = vmatprep.subr.bf16.mxu0 %v3703_v47  ;;  %v3796_v35 = vld [vmem:[#allocation36_spill] sm:$0xff] }
  0xb7   :  { %v3360_v21 = vpack.c.bf16 %v3763_v9, %v3762_v17  ;;  %v3366_v43 = vpack.c.bf16 %v3765_v19, %v3764_v27  ;;  %v3771_v4 = vand.u32 4294901760, %v2987_v7  ;;  %v3772_v17 = vand.u32 4294901760, %v2990_v53 }
  0xb8   :  { %v3372_v52 = vpack.c.bf16 %v3768_v45, %v3767_v46  ;;  %v3773_v9 = vand.u32 4294901760, %v2997_v49  ;;  %v3774_v19 = vand.u32 4294901760, %v3001_v32  ;;  %v2296_v31 = vpack.c.bf16 %v2905_v24, %v2903_v23 }
  0xb9   :  { %3766 = vst [vmem:[#allocation37_spill] sm:$0xff] %v3366_v43  ;;  %v3379_v11 = vpack.c.bf16 %v3771_v4, %v3770_v56  ;;  %v3775_v43 = vld [vmem:[#allocation46_spill] sm:$0xff]  ;;  %v3778_v56 = vand.u32 4294901760, %v3014_v1  ;;  %v2300_v23 = vpack.c.bf16 %v2929_v62, %v2925_v59  ;;  %v2473_v24 = vpack.c.bf16 %v2937_v8, %v2933_v25 }
  0xba   :  { %3769 = vst [vmem:[#allocation38_spill] sm:$0xff] %v3372_v52  ;;  %v3385_v27 = vpack.c.bf16 %v3773_v9, %v3772_v17  ;;  %v3776_v46 = vand.u32 4294901760, %v3775_v43  ;;  %v3777_v52 = vand.u32 4294901760, %v3009_v60  ;;  %v2470_v17 = vpack.c.bf16 %v2915_v41, %v2913_v40  ;;  %2297 = vmatprep.subr.bf16.mxu1 %v2296_v31  ;;  %v3803_v31 = vld [vmem:[#allocation47_spill] sm:$0xff] }
  0xbb   :  { %v2298_v9 = vpack.c.bf16 %v2921_v57, %v2919_v55  ;;  %v2302_v40 = vpack.c.bf16 %v3755_v44, %v2939_v34  ;;  %v2304_v41 = vpack.c.bf16 %v3758_v54, %v2948_v37  ;;  %v2476_v55 = vpack.c.bf16 %v3720_v6, %v2955_v2  ;;  %v3781_v37 = vld [vmem:[#allocation17_spill] sm:$0xff]  ;;  %v3797_v44 = vld [vmem:[#allocation39_spill] sm:$0xff]  ;;  %v3798_v54 = vld [vmem:[#allocation40_spill] sm:$0xff] }
  0xbc   :  { %v3391_v45 = vpack.c.bf16 %v3776_v46, %v3774_v19  ;;  %v3399_v4 = vpack.c.bf16 %v3778_v56, %v3777_v52  ;;  %2471 = vmatpush3.bf16.msra.mxu0 %v2470_v17  ;;  %v2306_v57 = vpack.c.bf16 %v2966_v61, %v3721_v29  ;;  %v2308_v59 = vpack.c.bf16 %v2973_v16, %v2970_v36  ;;  %v3779_v36 = vld [vmem:[#allocation16_spill] sm:$0xff]  ;;  %v3780_v16 = vld [vmem:[#allocation49_spill] sm:$0xff]  ;;  %v3792_v29 = vld [vmem:[#allocation30_spill] sm:$0xff] }
  0xbd   :  { %2299 = vmatpush3.bf16.msra.mxu1 %v2298_v9  ;;  %2472 = vmatprep.subr.bf16.mxu0 %v3703_v47  ;;  %v2479_v62 = vpack.c.bf16 %v3722_v58, %v2977_v48  ;;  %v2310_v2 = vpack.c.bf16 %v2987_v7, %v2985_v33  ;;  %v2312_v25 = vpack.c.bf16 %v2997_v49, %v2990_v53  ;;  %v3782_v48 = vld [vmem:[#allocation18_spill] sm:$0xff]  ;;  %v3783_v61 = vld [vmem:[#allocation21_spill] sm:$0xff]  ;;  %v3785_v33 = vld [vmem:[#allocation23_spill] sm:$0xff]  ;;  %v3804_v56 = vand.u32 4294901760, %v3780_v16 }
  0xbe   :  { %2301 = vmatprep.subr.bf16.mxu1 %v2300_v23  ;;  %v2482_v8 = vpack.c.bf16 %v3775_v43, %v3001_v32  ;;  %v2314_v34 = vpack.c.bf16 %v3014_v1, %v3009_v60  ;;  %v3784_v60 = vld [vmem:[#allocation22_spill] sm:$0xff]  ;;  %v3786_v7 = vld [vmem:[#allocation24_spill] sm:$0xff]  ;;  %v3787_v53 = vld [vmem:[#allocation25_spill] sm:$0xff] }
  0xbf   :  { %v3788_v49 = vld [vmem:[#allocation26_spill] sm:$0xff]  ;;  %v3789_v32 = vld [vmem:[#allocation27_spill] sm:$0xff]  ;;  %v3790_v1 = vld [vmem:[#allocation28_spill] sm:$0xff] }
  0xc0   :  { %2474 = vmatpush3.bf16.msra.mxu0 %v2473_v24  ;;  %v3791_v6 = vld [vmem:[#allocation29_spill] sm:$0xff]  ;;  %v3793_v58 = vld [vmem:[#allocation31_spill] sm:$0xff]  ;;  %v3801_v19 = vld [vmem:[#allocation44_spill] sm:$0xff] }
  0xc1   :  { %2303 = vmatpush3.bf16.msra.mxu1 %v2302_v40  ;;  %2475 = vmatprep.subr.bf16.mxu0 %v3703_v47  ;;  %v3799_v43 = vld [vmem:[#allocation41_spill] sm:$0xff]  ;;  %v3800_v52 = vld [vmem:[#allocation43_spill] sm:$0xff] }
  0xc2   :  { %2305 = vmatprep.subr.bf16.mxu1 %v2304_v41  ;;  %v3802_v46 = vld [vmem:[#allocation45_spill] sm:$0xff] }
  0xc4   :  { %2477 = vmatpush3.bf16.msra.mxu0 %v2476_v55 }
  0xc5   :  { %2307 = vmatpush3.bf16.msra.mxu1 %v2306_v57  ;;  %2478 = vmatprep.subr.bf16.mxu0 %v3703_v47 }
  0xc6   :  { %2309 = vmatprep.subr.bf16.mxu1 %v2308_v59 }
  0xc8   :  { %2480 = vmatpush3.bf16.msra.mxu0 %v2479_v62 }
  0xc9   :  { %2311 = vmatpush3.bf16.msra.mxu1 %v2310_v2  ;;  %2481 = vmatprep.subr.bf16.mxu0 %v3703_v47 }
  0xca   :  { %2313 = vmatprep.subr.bf16.mxu1 %v2312_v25 }
  0xcc   :  { %2483 = vmatpush3.bf16.msra.mxu0 %v2482_v8 }
  0xcd   :  { %2315 = vmatpush3.bf16.msra.mxu1 %v2314_v34  ;;  %2484 = vmatprep.subr.bf16.mxu0 %v3703_v47 }
  0xce   :  { %2317 = vmatprep.subr.bf16.mxu1 %v3779_v36 }
  0xcf   :  { %2113 = vmatmul.mubr.f32.vlgmr.msra.gmra.mrb[0].mxu0 %v3780_v16 }
  0xd0   :  { %650 = vmatmul.mubr.f32.vlgmr.msra.gmra.mrb[4].mxu1 %v3719_v30  ;;  %2486 = vmatpush3.bf16.msra.mxu0 %v3781_v37 }
  0xd1   :  { %2319 = vmatpush3.bf16.msra.mxu1 %v3782_v48  ;;  %2487 = vmatprep.subr.bf16.mxu0 %v3703_v47 }
  0xd2   :  { %2321 = vmatprep.subr.bf16.mxu1 %v3783_v61  ;;  %754 = vmatprep.mubr.f32.mxu1 %v3719_v30 }
  0xd3   :  { %2147 = vmatprep.mubr.msk.f32.mxu0 %vm2727_vm0, %v3719_v30 }
  0xd4   :  { %2489 = vmatpush3.bf16.msra.mxu0 %v3784_v60 }
  0xd5   :  { %2323 = vmatpush3.bf16.msra.mxu1 %v3785_v33  ;;  %2490 = vmatprep.subr.bf16.mxu0 %v3703_v47 }
  0xd6   :  { %2325 = vmatprep.subr.bf16.mxu1 %v3786_v7 }
  0xd8   :  { %2492 = vmatpush3.bf16.msra.mxu0 %v3787_v53 }
  0xd9   :  { %2327 = vmatpush3.bf16.msra.mxu1 %v3788_v49  ;;  %2493 = vmatprep.subr.bf16.mxu0 %v3703_v47 }
  0xda   :  { %2329 = vmatprep.subr.bf16.mxu1 %v3789_v32 }
  0xdc   :  { %2495 = vmatpush3.bf16.msra.mxu0 %v3790_v1 }
  0xdd   :  { %2331 = vmatpush3.bf16.msra.mxu1 %v3791_v6  ;;  %2496 = vmatprep.subr.bf16.mxu0 %v3703_v47 }
  0xde   :  { %2333 = vmatprep.subr.bf16.mxu1 %v3792_v29 }
  0xe0   :  { %2498 = vmatpush3.bf16.msra.mxu0 %v3793_v58 }
  0xe1   :  { %2335 = vmatpush3.bf16.msra.mxu1 %v3794_v15  ;;  %2499 = vmatprep.subr.bf16.mxu0 %v3703_v47 }
  0xe2   :  { %2337 = vmatprep.subr.bf16.mxu1 %v3795_v42 }
  0xe4   :  { %2501 = vmatpush3.bf16.msra.mxu0 %v3796_v35 }
  0xe5   :  { %2339 = vmatpush3.bf16.msra.mxu1 %v3797_v44  ;;  %2502 = vmatprep.subr.bf16.mxu0 %v3703_v47 }
  0xe6   :  { %2341 = vmatprep.subr.bf16.mxu1 %v3798_v54 }
  0xe8   :  { %2504 = vmatpush3.bf16.msra.mxu0 %v3799_v43 }
  0xe9   :  { %2343 = vmatpush3.bf16.msra.mxu1 %v3800_v52  ;;  %2505 = vmatprep.subr.bf16.mxu0 %v3703_v47 }
  0xea   :  { %2345 = vmatprep.subr.bf16.mxu1 %v3801_v19 }
  0xec   :  { %2507 = vmatpush3.bf16.msra.mxu0 %v3802_v46 }
  0xed   :  { %2347 = vmatpush3.bf16.msra.mxu1 %v3803_v31  ;;  %2508 = vmatprep.subr.bf16.mxu0 %v3703_v47 }
  0xee   :  { %2349 = vmatprep.subr.bf16.mxu1 %v3253_v38  ;;  %v3806_v38 = vld [vmem:[#allocation38_spill] sm:$0xff] }
  0xef   :  { %2148 = vmatmul.mubr.f32.vlgmr.msra.gmra.mrb[0].mxu0 %v3804_v56 }
  0xf0   :  { %758 = vmatmul.mubr.f32.vlgmr.msra.gmra.mrb[6].mxu1 %v3719_v30  ;;  %2510 = vmatpush3.bf16.msra.mxu0 %v3259_v39  ;;  %v3807_v39 = vld [vmem:[#allocation48_spill] sm:$0xff] }
  0xf1   :  { %2351 = vmatpush3.bf16.msra.mxu1 %v3265_v63  ;;  %2511 = vmatprep.subr.bf16.mxu0 %v3703_v47  ;;  %v3805_v63 = vld [vmem:[#allocation37_spill] sm:$0xff] }
  0xf2   :  { %2353 = vmatprep.subr.bf16.mxu1 %v3272_v28  ;;  %924 = vmatprep.mubr.f32.mxu1 %v3719_v30 }
  0xf3   :  { %2182 = vmatprep.mubr.msk.f32.mxu0 %vm2727_vm0, %v3719_v30 }
  0xf4   :  { %2513 = vmatpush3.bf16.msra.mxu0 %v3278_v18 }
  0xf5   :  { %2355 = vmatpush3.bf16.msra.mxu1 %v3284_v51  ;;  %2514 = vmatprep.subr.bf16.mxu0 %v3703_v47 }
  0xf6   :  { %2357 = vmatprep.subr.bf16.mxu1 %v3291_v0 }
  0xf8   :  { %2516 = vmatpush3.bf16.msra.mxu0 %v3297_v12 }
  0xf9   :  { %2359 = vmatpush3.bf16.msra.mxu1 %v3303_v14  ;;  %2517 = vmatprep.subr.bf16.mxu0 %v3703_v47 }
  0xfa   :  { %2361 = vmatprep.subr.bf16.mxu1 %v3310_v26 }
  0xfc   :  { %2519 = vmatpush3.bf16.msra.mxu0 %v3316_v10 }
  0xfd   :  { %2363 = vmatpush3.bf16.msra.mxu1 %v3322_v20  ;;  %2520 = vmatprep.subr.bf16.mxu0 %v3703_v47 }
  0xfe   :  { %2365 = vmatprep.subr.bf16.mxu1 %v3330_v22 }
 0x100   :  { %2522 = vmatpush3.bf16.msra.mxu0 %v3336_v5 }
 0x101   :  { %2367 = vmatpush3.bf16.msra.mxu1 %v3342_v50  ;;  %2523 = vmatprep.subr.bf16.mxu0 %v3703_v47 }
 0x102   :  { %2369 = vmatprep.subr.bf16.mxu1 %v3348_v3 }
 0x104   :  { %2525 = vmatpush3.bf16.msra.mxu0 %v3354_v13 }
 0x105   :  { %2371 = vmatpush3.bf16.msra.mxu1 %v3360_v21  ;;  %2526 = vmatprep.subr.bf16.mxu0 %v3703_v47 }
 0x106   :  { %2373 = vmatprep.subr.bf16.mxu1 %v3805_v63 }
 0x108   :  { %2528 = vmatpush3.bf16.msra.mxu0 %v3806_v38 }
 0x109   :  { %2375 = vmatpush3.bf16.msra.mxu1 %v3379_v11  ;;  %2529 = vmatprep.subr.bf16.mxu0 %v3703_v47 }
 0x10a   :  { %2377 = vmatprep.subr.bf16.mxu1 %v3385_v27 }
 0x10c   :  { %2531 = vmatpush3.bf16.msra.mxu0 %v3391_v45 }
 0x10d   :  { %2379 = vmatpush3.bf16.msra.mxu1 %v3399_v4  ;;  %2532 = vmatprep.subr.bf16.mxu0 %v3703_v47 }
 0x10e   :  { %2381 = vmatprep.subr.bf16.mxu1 %v3779_v36 }
 0x10f   :  { %2183 = vmatmul.mubr.f32.vlgmr.msra.gmra.mrb[0].mxu0 %v3807_v39 }
 0x110   :  { %926 = vmatmul.mubr.f32.vlgmr.msra.gmra.mrb[8].mxu1 %v3719_v30  ;;  %2534 = vmatpush3.bf16.msra.mxu0 %v3781_v37 }
 0x111   :  { %2383 = vmatpush3.bf16.msra.mxu1 %v3782_v48  ;;  %2535 = vmatprep.subr.bf16.mxu0 %v3703_v47 }
 0x112   :  { %2385 = vmatprep.subr.bf16.mxu1 %v3783_v61  ;;  %2217 = vmatprep.mubr.msk.f32.mxu0 %vm2727_vm0, %v3719_v30 }
 0x113   :  { %1028 = vmatprep.mubr.f32.mxu1 %v3719_v30 }
 0x114   :  { %2537 = vmatpush3.bf16.msra.mxu0 %v3784_v60 }
 0x115   :  { %2387 = vmatpush3.bf16.msra.mxu1 %v3785_v33  ;;  %2538 = vmatprep.subr.bf16.mxu0 %v3703_v47 }
 0x116   :  { %2389 = vmatprep.subr.bf16.mxu1 %v3786_v7 }
 0x118   :  { %2540 = vmatpush3.bf16.msra.mxu0 %v3787_v53 }
 0x119   :  { %2391 = vmatpush3.bf16.msra.mxu1 %v3788_v49  ;;  %2541 = vmatprep.subr.bf16.mxu0 %v3703_v47 }
 0x11a   :  { %2393 = vmatprep.subr.bf16.mxu1 %v3789_v32 }
 0x11c   :  { %2543 = vmatpush3.bf16.msra.mxu0 %v3790_v1 }
 0x11d   :  { %2395 = vmatpush3.bf16.msra.mxu1 %v3791_v6  ;;  %2544 = vmatprep.subr.bf16.mxu0 %v3703_v47 }
 0x11e   :  { %2397 = vmatprep.subr.bf16.mxu1 %v3792_v29 }
 0x120   :  { %2546 = vmatpush3.bf16.msra.mxu0 %v3793_v58 }
 0x121   :  { %2399 = vmatpush3.bf16.msra.mxu1 %v3794_v15  ;;  %2547 = vmatprep.subr.bf16.mxu0 %v3703_v47 }
 0x122   :  { %2401 = vmatprep.subr.bf16.mxu1 %v3795_v42 }
 0x124   :  { %2549 = vmatpush3.bf16.msra.mxu0 %v3796_v35 }
 0x125   :  { %2403 = vmatpush3.bf16.msra.mxu1 %v3797_v44  ;;  %2550 = vmatprep.subr.bf16.mxu0 %v3703_v47 }
 0x126   :  { %2405 = vmatprep.subr.bf16.mxu1 %v3798_v54 }
 0x128   :  { %2552 = vmatpush3.bf16.msra.mxu0 %v3799_v43 }
 0x129   :  { %2407 = vmatpush3.bf16.msra.mxu1 %v3800_v52  ;;  %2553 = vmatprep.subr.bf16.mxu0 %v3703_v47 }
 0x12a   :  { %2409 = vmatprep.subr.bf16.mxu1 %v3801_v19 }
 0x12c   :  { %2555 = vmatpush3.bf16.msra.mxu0 %v3802_v46 }
 0x12d   :  { %2411 = vmatpush3.bf16.msra.mxu1 %v3803_v31 }
 0x12f   :  { %2218 = vmatmul.mubr.f32.vlgmr.msra.gmra.mrb[0].mxu0 %v3807_v39 }
 0x130   :  { %1030 = vmatmul.mubr.f32.vlgmr.msra.gmra.mrb[10].mxu1 %v3719_v30 }
 0x155   :  { %v1730_v28 = vpop.f32.mrb[0].mxu1 }
 0x156   :  { %v1731_v18 = vpop.f32.mrb[1].mxu1 }
 0x157   :  { %v1732_v51 = vadd.f32 %v1731_v18, %v1730_v28 }
 0x180   :  { %v1765_v0 = vpop.f32.mrb[2].mxu1 }
 0x181   :  { %v1766_v12 = vpop.f32.mrb[3].mxu1 }
 0x182   :  { %v1767_v14 = vadd.f32 %v1766_v12, %v1765_v0 }
 0x184   :  { %v514_v26 = vadd.f32 %v1767_v14, %v1732_v51 }
 0x1a3   :  { %v1800_v10 = vpop.f32.mrb[4].mxu1 }
 0x1a4   :  { %v1801_v20 = vpop.f32.mrb[5].mxu1 }
 0x1a5   :  { %v1802_v47 = vadd.f32 %v1801_v20, %v1800_v10 }
 0x1a7   :  { %v652_v22 = vadd.f32 %v1802_v47, %v514_v26 }
 0x1c3   :  { %v1835_v5 = vpop.f32.mrb[6].mxu1 }
 0x1c4   :  { %v1836_v50 = vpop.f32.mrb[7].mxu1 }
 0x1c5   :  { %v1837_v3 = vadd.f32 %v1836_v50, %v1835_v5 }
 0x1c7   :  { %v760_v13 = vadd.f32 %v1837_v3, %v652_v22 }
 0x1e3   :  { %v1870_v21 = vpop.f32.mrb[8].mxu1 }
 0x1e4   :  { %v1871_v11 = vpop.f32.mrb[9].mxu1 }
 0x1e5   :  { %v1872_v27 = vadd.f32 %v1871_v11, %v1870_v21 }
 0x1e7   :  { %v928_v45 = vadd.f32 %v1872_v27, %v760_v13 }
 0x202   :  { %v1672_v30 = vpop.f32.mrb[0].mxu0 }
 0x203   :  { %v1905_v4 = vpop.f32.mrb[10].mxu1  ;;  %v2219_v17 = vpop.f32.mrb[1].mxu0 }
 0x204   :  { %v1906_v9 = vpop.f32.mrb[11].mxu1 }
 0x205   :  { %v1907_v23 = vadd.f32 %v1906_v9, %v1905_v4 }
 0x207   :  { %v1032_v24 = vadd.f32 %v1907_v23, %v928_v45 }
 0x209   :  { %v2556_v40 = vadd.f32 %v1672_v30, %v1032_v24 }
 0x20b   :  { %1676 = vst [vmem:[#allocation11] sm:$0xff] %v2556_v40 }
 0x20c   :  { %2699 = shalt.err (!%p2696_p2)
}
 0x20d   :  { %s2700_s3 = scalar_lea.hbm %s3565_s5, 128 }
 0x20e   :  { %p2701_p3 = scmp.ne.s32.totalorder %s3565_s5, %s2700_s3  ;;  %p2704_p4 = scmp.lt.u32.totalorder %s2700_s3, %s3565_s5 }
 0x210   :  { %p2706_p5 = pnand %p2704_p4, %p2701_p3 }
 0x212   :  { %2709 = shalt.err (!%p2706_p5)
}
 0x213   :  { %1686 = dma.vmem_to_hbm [thread:$0]  %s1684_s1, 128, %s3565_s5, [#allocation4]  }
 0x214   :  { %2716 = dma.done.wait [#allocation4], 128  }
 0x215   :  { %2717 = vsyncadd [#allocation4], 4294967168 }
 0x216   :  { %1690 = vsyncpa [#allocation3], 1 }
 0x217   :  { %1691 = vsyncpa [#allocation6], 1 }
 0x218   :  { %1692 = vsyncpa [#allocation9], 1 }
 0x219   :  { %1693 = vsyncpa [#allocation4], 1 }

</bundles_post_ra>
